<compile_context>
chip_gen: v7x
topology: tpu7x:2x2x1
jax: 0.10.0
libtpu: 0.0.40
codegen_flags: <defaults>
</compile_context>

<pallas_src>
import functools

import jax
import jax.numpy as jnp
from jax.experimental import pallas as pl
from jax.experimental.pallas import tpu as pltpu

# ---- model hyper-parameters (mirrors ManeuverModel.__init__ defaults) ----
N_FEATURES = 8      # n_features
N_CLASSES = 5       # n_classes
N_HIDDEN = 24       # n_hidden
N_LAYERS = 4        # n_layers
N_LIN1 = 64         # n_features_linear1
N_LIN2 = 32         # n_features_linear2

H_PAD = 32          # hidden padded so L * H_PAD == 128 (one vreg lane width)

# ---- problem sizes for the demo run ----
BATCH = 8
SEQ_LEN = 8


# --------------------------------------------------------------------------
# Pallas kernel
# --------------------------------------------------------------------------
def maneuver_kernel(
    x_ref,        # (T*B, Hp)      time-major input, features zero-padded F->Hp
    wx_ref,       # (Hp, 4*GL)     layer-0 W_ih^T scattered into its gate cols
    wh_ref,       # (GL, 4*GL)     fused W_hh_l + W_ih_{l+1} blocks, all layers
    b_ref,        # (1, 4*GL)      b_ih + b_hh for every layer / gate column
    w1_ref,       # (GL, 64)       head layer 1 (only last-layer rows nonzero)
    b1_ref,       # (1, 64)
    w2_ref,       # (64, 32)
    b2_ref,       # (1, 32)
    wc_ref,       # (32, C)
    bc_ref,       # (1, C)
    out_ref,      # (B, C)
    *,
    T,
    B,
    L,
    Hp,
):
    f32 = jnp.float32
    GL = L * Hp                                   # 128: fused hidden width

    # Hoisted layer-0 input projection + biases for every (t, layer, gate):
    # one MXU pass off the serial critical path.
    pre = jnp.dot(x_ref[...], wx_ref[...],
                  preferred_element_type=f32) + b_ref[...]       # (T*B, 4*GL)

    wh = wh_ref[...]                                             # (GL, 4*GL)

    # Fused state of all L layers: exactly one f32 vreg each.
    h_all = jnp.zeros((B, GL), f32)
    c_all = jnp.zeros((B, GL), f32)

    # Hoisted iota for the ramp-up / ramp-down commit masks.
    col_ids = jax.lax.broadcasted_iota(jnp.int32, (1, GL), 1)

    n_waves = L + T - 1
    for w in range(n_waves):                      # fully unrolled (11 waves)
        t0 = min(w, T - 1)
        # One fused matmul computes the gate pre-activations of every cell
        # (l, t = w - l) of this wave: h_all feeds both each layer's recurrent
        # term and the next layer's input term.
        gates = (jnp.dot(h_all, wh, preferred_element_type=f32)
                 + pre[t0 * B:(t0 + 1) * B])                     # (B, 4*GL)

        # Packed gate-column layout is [ i | f | o | g ], GL lanes each, so the
        # nonlinearities are two full-width EUP launches and every slice below
        # is vreg-aligned.
        sig = jax.nn.sigmoid(gates[:, :3 * GL])
        i_all = sig[:, 0 * GL:1 * GL]
        f_all = sig[:, 1 * GL:2 * GL]
        o_all = sig[:, 2 * GL:3 * GL]
        g_all = jnp.tanh(gates[:, 3 * GL:4 * GL])

        c_new = f_all * c_all + i_all * g_all                    # (B, GL)
        h_new = o_all * jnp.tanh(c_new)

        # Commit only the layers active in this wave (static per wave).
        lo = max(0, w - T + 1)
        hi = min(L - 1, w)
        if lo == 0 and hi == L - 1:
            c_all, h_all = c_new, h_new
        else:
            keep = (col_ids >= lo * Hp) & (col_ids < (hi + 1) * Hp)
            c_all = jnp.where(keep, c_new, c_all)
            h_all = jnp.where(keep, h_new, h_all)

    # ----- linear head (dropout is identity in eval mode) -----
    # w1 only has nonzero rows for the last layer's columns of h_all, so the
    # fused state feeds it directly (no lane-offset slice needed).
    z1 = jnp.maximum(
        jnp.dot(h_all, w1_ref[...], preferred_element_type=f32)
        + b1_ref[...], 0.0)
    z2 = jnp.maximum(
        jnp.dot(z1, w2_ref[...], preferred_element_type=f32)
        + b2_ref[...], 0.0)
    out_ref[...] = (
        jnp.dot(z2, wc_ref[...], preferred_element_type=f32) + bc_ref[...])


# --------------------------------------------------------------------------
# One-time weight packing (outside the per-inference path)
# --------------------------------------------------------------------------
def pack_params(params):
    """Pad / transpose / fuse PyTorch-layout weights into the kernel layout.

    Gate-column layout: 4 regions [i | f | o | g] of GL = L*Hp lanes each;
    within a region, layer l occupies columns [l*Hp, l*Hp + H) (rest is exact
    zero padding).  Run once; the result is reused by every forward call.
    """
    H, Hp, L, F = N_HIDDEN, H_PAD, N_LAYERS, N_FEATURES
    GL, GC = Hp * L, 4 * Hp * L
    region_of = (0, 1, 3, 2)       # PyTorch gate order (i, f, g, o) -> region

    w_x = jnp.zeros((Hp, GC), jnp.float32)
    w_h = jnp.zeros((GL, GC), jnp.float32)
    bias = jnp.zeros((GC,), jnp.float32)
    for l in range(L):
        wih = params["wih0"] if l == 0 else params["wih_r"][l - 1]   # (4H, in)
        whh = params["whh0"] if l == 0 else params["whh_r"][l - 1]   # (4H, H)
        b = params["b0"] if l == 0 else params["b_r"][l - 1]         # (4H,)
        for g in range(4):
            col = region_of[g] * GL + l * Hp
            wih_t = wih[g * H:(g + 1) * H, :].T                      # (in, H)
            whh_t = whh[g * H:(g + 1) * H, :].T                      # (H, H)
            if l == 0:
                # layer 0's input is x: hoisted projection weight
                w_x = w_x.at[:F, col:col + H].set(wih_t)
            else:
                # layer l's input is h_{l-1}: rows of the fused recurrent weight
                w_h = w_h.at[(l - 1) * Hp:(l - 1) * Hp + H,
                             col:col + H].set(wih_t)
            # layer l's recurrent weight
            w_h = w_h.at[l * Hp:l * Hp + H, col:col + H].set(whh_t)
            bias = bias.at[col:col + H].set(b[g * H:(g + 1) * H])

    # head layer 1 lifted onto the fused hidden state (only last layer's rows)
    w1_full = jnp.zeros((GL, N_LIN1), jnp.float32)
    w1_full = w1_full.at[(L - 1) * Hp:(L - 1) * Hp + H, :].set(params["w1"].T)

    return {
        "w_x": w_x,
        "w_h": w_h,
        "b": bias.reshape(1, GC),
        "w1": w1_full,
        "b1": params["b1"].reshape(1, N_LIN1),
        "w2": params["w2"].T,
        "b2": params["b2"].reshape(1, N_LIN2),
        "wc": params["wc"].T,
        "bc": params["bc"].reshape(1, N_CLASSES),
    }


# --------------------------------------------------------------------------
# Parameter init (PyTorch-style uniform(-k, k))
# --------------------------------------------------------------------------
def init_params(key):
    H, F, L = N_HIDDEN, N_FEATURES, N_LAYERS
    ks = jax.random.split(key, 4 * L + 6)
    k_lstm = 1.0 / jnp.sqrt(H)

    def unif(k, shape, bound):
        return jax.random.uniform(k, shape, jnp.float32, -bound, bound)

    params = {}
    params["wih0"] = unif(ks[0], (4 * H, F), k_lstm)
    params["whh0"] = unif(ks[1], (4 * H, H), k_lstm)
    params["b0"] = unif(ks[2], (4 * H,), k_lstm) + unif(ks[3], (4 * H,), k_lstm)
    wih_r, whh_r, b_r = [], [], []
    for l in range(1, L):
        base = 4 * l
        wih_r.append(unif(ks[base + 0], (4 * H, H), k_lstm))
        whh_r.append(unif(ks[base + 1], (4 * H, H), k_lstm))
        b_r.append(unif(ks[base + 2], (4 * H,), k_lstm)
                   + unif(ks[base + 3], (4 * H,), k_lstm))
    params["wih_r"] = jnp.stack(wih_r)            # (L-1, 4H, H)
    params["whh_r"] = jnp.stack(whh_r)            # (L-1, 4H, H)
    params["b_r"] = jnp.stack(b_r)                # (L-1, 4H)
    j = 4 * L
    params["w1"] = unif(ks[j + 0], (N_LIN1, H), 1.0 / jnp.sqrt(H))
    params["b1"] = unif(ks[j + 1], (N_LIN1,), 1.0 / jnp.sqrt(H))
    params["w2"] = unif(ks[j + 2], (N_LIN2, N_LIN1), 1.0 / jnp.sqrt(N_LIN1))
    params["b2"] = unif(ks[j + 3], (N_LIN2,), 1.0 / jnp.sqrt(N_LIN1))
    params["wc"] = unif(ks[j + 4], (N_CLASSES, N_LIN2), 1.0 / jnp.sqrt(N_LIN2))
    params["bc"] = unif(ks[j + 5], (N_CLASSES,), 1.0 / jnp.sqrt(N_LIN2))
    return params


# --------------------------------------------------------------------------
# Wrapper (only per-call input prep lives here; weights come pre-packed)
# --------------------------------------------------------------------------
@jax.jit
def maneuver_forward(x_btf, packed):
    """x_btf: (B, T, F) batch_first, like the PyTorch module. Returns (B, C)."""
    B, T, F = x_btf.shape
    Hp, L = H_PAD, N_LAYERS
    GL, GC = Hp * L, 4 * Hp * L

    # keep batch a multiple of 8 (one f32 sublane tile) -- free, preserves
    # one-vreg gate/state tensors in the recurrence.
    B_pad = ((B + 7) // 8) * 8
    x = x_btf.astype(jnp.float32)
    if B_pad != B:
        x = jnp.concatenate(
            [x, jnp.zeros((B_pad - B, T, F), jnp.float32)], axis=0)

    # time-major, flattened, features zero-padded F -> Hp
    xt = jnp.transpose(x, (1, 0, 2)).reshape(T * B_pad, F)
    x_pad = jnp.zeros((T * B_pad, Hp), jnp.float32).at[:, :F].set(xt)

    args = (x_pad, packed["w_x"], packed["w_h"], packed["b"],
            packed["w1"], packed["b1"], packed["w2"], packed["b2"],
            packed["wc"], packed["bc"])

    # advisory cost estimate (tiny, serial-latency-bound kernel)
    n_waves = L + T - 1
    flops = (2 * T * B_pad * Hp * GC                  # hoisted input projection
             + 2 * n_waves * B_pad * GL * GC          # per-wave fused matmul
             + 2 * B_pad * (GL * N_LIN1 + N_LIN1 * N_LIN2
                            + N_LIN2 * N_CLASSES)     # head
             + n_waves * B_pad * GC * 4)              # gate elementwise
    transcendentals = n_waves * B_pad * (GC + GL)
    bytes_accessed = 4 * (sum(int(a.size) for a in args) + B_pad * N_CLASSES)

    vmem_spec = pl.BlockSpec(memory_space=pltpu.MemorySpace.VMEM)
    kernel = functools.partial(maneuver_kernel, T=T, B=B_pad, L=L, Hp=Hp)

    # Grid-less single invocation: at this size a grid (or megacore split on
    # v7x) would only add per-step pipeline overhead. Footprint < 1 MiB VMEM.
    out = pl.pallas_call(
        kernel,
        out_shape=jax.ShapeDtypeStruct((B_pad, N_CLASSES), jnp.float32),
        in_specs=[vmem_spec] * len(args),
        out_specs=vmem_spec,
        cost_estimate=pl.CostEstimate(
            flops=int(flops),
            transcendentals=int(transcendentals),
            bytes_accessed=int(bytes_accessed)),
    )(*args)
    return out[:B]


# --------------------------------------------------------------------------
# Pure-JAX reference of the PyTorch forward (eval mode)
# --------------------------------------------------------------------------
def maneuver_forward_ref(x_btf, params):
    H, L = N_HIDDEN, N_LAYERS
    x = x_btf.astype(jnp.float32)
    B, T, _ = x.shape
    seq = x
    h_last = None
    for l in range(L):
        wih = params["wih0"] if l == 0 else params["wih_r"][l - 1]
        whh = params["whh0"] if l == 0 else params["whh_r"][l - 1]
        b = params["b0"] if l == 0 else params["b_r"][l - 1]
        h = jnp.zeros((B, H), jnp.float32)
        c = jnp.zeros((B, H), jnp.float32)
        outs = []
        for t in range(T):
            g = seq[:, t, :] @ wih.T + h @ whh.T + b
            i_g = jax.nn.sigmoid(g[:, 0 * H:1 * H])
            f_g = jax.nn.sigmoid(g[:, 1 * H:2 * H])
            g_g = jnp.tanh(g[:, 2 * H:3 * H])
            o_g = jax.nn.sigmoid(g[:, 3 * H:4 * H])
            c = f_g * c + i_g * g_g
            h = o_g * jnp.tanh(c)
            outs.append(h)
        seq = jnp.stack(outs, axis=1)
        h_last = h
    z = jnp.maximum(h_last @ params["w1"].T + params["b1"], 0.0)
    z = jnp.maximum(z @ params["w2"].T + params["b2"], 0.0)
    return z @ params["wc"].T + params["bc"]


if __name__ == "__main__":
    key = jax.random.PRNGKey(0)
    k_x, k_p = jax.random.split(key)
    x = jax.random.normal(k_x, (BATCH, SEQ_LEN, N_FEATURES), jnp.float32)
    params = init_params(k_p)

    # Pack the weights ONCE, outside the per-inference path.
    packed = jax.tree_util.tree_map(jax.block_until_ready, pack_params(params))

    out = maneuver_forward(x, packed)
    out = jax.block_until_ready(out)
    assert out.shape == (BATCH, N_CLASSES)

    ref = maneuver_forward_ref(x, params)
    assert jnp.allclose(out, ref, atol=2e-3, rtol=2e-3), (
        f"mismatch: max abs diff {jnp.max(jnp.abs(out - ref))}")

    # predict() equivalent: argmax over classes per row
    _ = jnp.argmax(out, axis=-1)

    print("KERNEL_OK")
</pallas_src>

<mosaic_0001>
module attributes {stable_mosaic.version = 11 : i64} {
  func.func @maneuver_kernel(%arg0: memref<64x32xf32, #tpu.memory_space<vmem>>, %arg1: memref<32x512xf32, #tpu.memory_space<vmem>>, %arg2: memref<128x512xf32, #tpu.memory_space<vmem>>, %arg3: memref<1x512xf32, #tpu.memory_space<vmem>>, %arg4: memref<128x64xf32, #tpu.memory_space<vmem>>, %arg5: memref<1x64xf32, #tpu.memory_space<vmem>>, %arg6: memref<64x32xf32, #tpu.memory_space<vmem>>, %arg7: memref<1x32xf32, #tpu.memory_space<vmem>>, %arg8: memref<32x5xf32, #tpu.memory_space<vmem>>, %arg9: memref<1x5xf32, #tpu.memory_space<vmem>>, %arg10: memref<8x5xf32, #tpu.memory_space<vmem>>) attributes {dimension_semantics = [], scalar_prefetch = 0 : i64, scratch_operands = 0 : i64, tpu.core_type = #tpu.core_type<tc>} {
    %c0 = arith.constant 0 : index
    %c0_0 = arith.constant 0 : index
    %0 = vector.load %arg0[%c0, %c0_0] : memref<64x32xf32, #tpu.memory_space<vmem>>, vector<64x32xf32>
    %c0_1 = arith.constant 0 : index
    %c0_2 = arith.constant 0 : index
    %1 = vector.load %arg1[%c0_1, %c0_2] : memref<32x512xf32, #tpu.memory_space<vmem>>, vector<32x512xf32>
    %cst = arith.constant dense<0.000000e+00> : vector<64x512xf32>
    %2 = tpu.matmul %0, %1, %cst {dimension_numbers = #tpu.dot_dimension_numbers<[1], [0], [0], [1], [0, 0, 1, 1], [], []>} : vector<64x32xf32>, vector<32x512xf32>, vector<64x512xf32> -> vector<64x512xf32>
    %c0_3 = arith.constant 0 : index
    %c0_4 = arith.constant 0 : index
    %3 = vector.load %arg3[%c0_3, %c0_4] : memref<1x512xf32, #tpu.memory_space<vmem>>, vector<1x512xf32>
    %4 = vector.broadcast %3 : vector<1x512xf32> to vector<64x512xf32>
    %5 = arith.addf %2, %4 : vector<64x512xf32>
    %c0_5 = arith.constant 0 : index
    %c0_6 = arith.constant 0 : index
    %6 = vector.load %arg2[%c0_5, %c0_6] : memref<128x512xf32, #tpu.memory_space<vmem>>, vector<128x512xf32>
    %cst_7 = arith.constant 0.000000e+00 : f32
    %7 = vector.broadcast %cst_7 : f32 to vector<8x128xf32>
    %cst_8 = arith.constant 0.000000e+00 : f32
    %8 = vector.broadcast %cst_8 : f32 to vector<8x128xf32>
    %9 = tpu.iota {dimensions = array<i32: 1>} : vector<1x128xi32>
    %cst_9 = arith.constant dense<0.000000e+00> : vector<8x512xf32>
    %10 = tpu.matmul %7, %6, %cst_9 {dimension_numbers = #tpu.dot_dimension_numbers<[1], [0], [0], [1], [0, 0, 1, 1], [], []>} : vector<8x128xf32>, vector<128x512xf32>, vector<8x512xf32> -> vector<8x512xf32>
    %11 = vector.extract_strided_slice %5 {offsets = [0, 0], sizes = [8, 512], strides = [1, 1]} : vector<64x512xf32> to vector<8x512xf32>
    %12 = arith.addf %10, %11 : vector<8x512xf32>
    %13 = vector.extract_strided_slice %12 {offsets = [0, 0], sizes = [8, 384], strides = [1, 1]} : vector<8x512xf32> to vector<8x384xf32>
    %14 = arith.negf %13 : vector<8x384xf32>
    %15 = math.exp %14 : vector<8x384xf32>
    %cst_10 = arith.constant 1.000000e+00 : f32
    %16 = vector.broadcast %cst_10 : f32 to vector<8x384xf32>
    %17 = arith.addf %16, %15 : vector<8x384xf32>
    %18 = arith.divf %16, %17 : vector<8x384xf32>
    %19 = vector.extract_strided_slice %18 {offsets = [0, 0], sizes = [8, 128], strides = [1, 1]} : vector<8x384xf32> to vector<8x128xf32>
    %20 = vector.extract_strided_slice %18 {offsets = [0, 128], sizes = [8, 128], strides = [1, 1]} : vector<8x384xf32> to vector<8x128xf32>
    %21 = vector.extract_strided_slice %18 {offsets = [0, 256], sizes = [8, 128], strides = [1, 1]} : vector<8x384xf32> to vector<8x128xf32>
    %22 = vector.extract_strided_slice %12 {offsets = [0, 384], sizes = [8, 128], strides = [1, 1]} : vector<8x512xf32> to vector<8x128xf32>
    %23 = math.tanh %22 : vector<8x128xf32>
    %24 = arith.mulf %20, %8 : vector<8x128xf32>
    %25 = arith.mulf %19, %23 : vector<8x128xf32>
    %26 = arith.addf %24, %25 : vector<8x128xf32>
    %27 = math.tanh %26 : vector<8x128xf32>
    %28 = arith.mulf %21, %27 : vector<8x128xf32>
    %c0_i32 = arith.constant 0 : i32
    %29 = vector.broadcast %c0_i32 : i32 to vector<1x128xi32>
    %30 = arith.cmpi sge, %9, %29 : vector<1x128xi32>
    %c32_i32 = arith.constant 32 : i32
    %31 = vector.broadcast %c32_i32 : i32 to vector<1x128xi32>
    %32 = arith.cmpi slt, %9, %31 : vector<1x128xi32>
    %33 = arith.andi %30, %32 : vector<1x128xi1>
    %34 = vector.shape_cast %33 : vector<1x128xi1> to vector<1x128xi1>
    %35 = vector.broadcast %34 : vector<1x128xi1> to vector<8x128xi1>
    %36 = arith.select %35, %26, %8 : vector<8x128xi1>, vector<8x128xf32>
    %37 = vector.shape_cast %33 : vector<1x128xi1> to vector<1x128xi1>
    %38 = vector.broadcast %37 : vector<1x128xi1> to vector<8x128xi1>
    %39 = arith.select %38, %28, %7 : vector<8x128xi1>, vector<8x128xf32>
    %cst_11 = arith.constant dense<0.000000e+00> : vector<8x512xf32>
    %40 = tpu.matmul %39, %6, %cst_11 {dimension_numbers = #tpu.dot_dimension_numbers<[1], [0], [0], [1], [0, 0, 1, 1], [], []>} : vector<8x128xf32>, vector<128x512xf32>, vector<8x512xf32> -> vector<8x512xf32>
    %41 = vector.extract_strided_slice %5 {offsets = [8, 0], sizes = [8, 512], strides = [1, 1]} : vector<64x512xf32> to vector<8x512xf32>
    %42 = arith.addf %40, %41 : vector<8x512xf32>
    %43 = vector.extract_strided_slice %42 {offsets = [0, 0], sizes = [8, 384], strides = [1, 1]} : vector<8x512xf32> to vector<8x384xf32>
    %44 = arith.negf %43 : vector<8x384xf32>
    %45 = math.exp %44 : vector<8x384xf32>
    %cst_12 = arith.constant 1.000000e+00 : f32
    %46 = vector.broadcast %cst_12 : f32 to vector<8x384xf32>
    %47 = arith.addf %46, %45 : vector<8x384xf32>
    %48 = arith.divf %46, %47 : vector<8x384xf32>
    %49 = vector.extract_strided_slice %48 {offsets = [0, 0], sizes = [8, 128], strides = [1, 1]} : vector<8x384xf32> to vector<8x128xf32>
    %50 = vector.extract_strided_slice %48 {offsets = [0, 128], sizes = [8, 128], strides = [1, 1]} : vector<8x384xf32> to vector<8x128xf32>
    %51 = vector.extract_strided_slice %48 {offsets = [0, 256], sizes = [8, 128], strides = [1, 1]} : vector<8x384xf32> to vector<8x128xf32>
    %52 = vector.extract_strided_slice %42 {offsets = [0, 384], sizes = [8, 128], strides = [1, 1]} : vector<8x512xf32> to vector<8x128xf32>
    %53 = math.tanh %52 : vector<8x128xf32>
    %54 = arith.mulf %50, %36 : vector<8x128xf32>
    %55 = arith.mulf %49, %53 : vector<8x128xf32>
    %56 = arith.addf %54, %55 : vector<8x128xf32>
    %57 = math.tanh %56 : vector<8x128xf32>
    %58 = arith.mulf %51, %57 : vector<8x128xf32>
    %c0_i32_13 = arith.constant 0 : i32
    %59 = vector.broadcast %c0_i32_13 : i32 to vector<1x128xi32>
    %60 = arith.cmpi sge, %9, %59 : vector<1x128xi32>
    %c64_i32 = arith.constant 64 : i32
    %61 = vector.broadcast %c64_i32 : i32 to vector<1x128xi32>
    %62 = arith.cmpi slt, %9, %61 : vector<1x128xi32>
    %63 = arith.andi %60, %62 : vector<1x128xi1>
    %64 = vector.shape_cast %63 : vector<1x128xi1> to vector<1x128xi1>
    %65 = vector.broadcast %64 : vector<1x128xi1> to vector<8x128xi1>
    %66 = arith.select %65, %56, %36 : vector<8x128xi1>, vector<8x128xf32>
    %67 = vector.shape_cast %63 : vector<1x128xi1> to vector<1x128xi1>
    %68 = vector.broadcast %67 : vector<1x128xi1> to vector<8x128xi1>
    %69 = arith.select %68, %58, %39 : vector<8x128xi1>, vector<8x128xf32>
    %cst_14 = arith.constant dense<0.000000e+00> : vector<8x512xf32>
    %70 = tpu.matmul %69, %6, %cst_14 {dimension_numbers = #tpu.dot_dimension_numbers<[1], [0], [0], [1], [0, 0, 1, 1], [], []>} : vector<8x128xf32>, vector<128x512xf32>, vector<8x512xf32> -> vector<8x512xf32>
    %71 = vector.extract_strided_slice %5 {offsets = [16, 0], sizes = [8, 512], strides = [1, 1]} : vector<64x512xf32> to vector<8x512xf32>
    %72 = arith.addf %70, %71 : vector<8x512xf32>
    %73 = vector.extract_strided_slice %72 {offsets = [0, 0], sizes = [8, 384], strides = [1, 1]} : vector<8x512xf32> to vector<8x384xf32>
    %74 = arith.negf %73 : vector<8x384xf32>
    %75 = math.exp %74 : vector<8x384xf32>
    %cst_15 = arith.constant 1.000000e+00 : f32
    %76 = vector.broadcast %cst_15 : f32 to vector<8x384xf32>
    %77 = arith.addf %76, %75 : vector<8x384xf32>
    %78 = arith.divf %76, %77 : vector<8x384xf32>
    %79 = vector.extract_strided_slice %78 {offsets = [0, 0], sizes = [8, 128], strides = [1, 1]} : vector<8x384xf32> to vector<8x128xf32>
    %80 = vector.extract_strided_slice %78 {offsets = [0, 128], sizes = [8, 128], strides = [1, 1]} : vector<8x384xf32> to vector<8x128xf32>
    %81 = vector.extract_strided_slice %78 {offsets = [0, 256], sizes = [8, 128], strides = [1, 1]} : vector<8x384xf32> to vector<8x128xf32>
    %82 = vector.extract_strided_slice %72 {offsets = [0, 384], sizes = [8, 128], strides = [1, 1]} : vector<8x512xf32> to vector<8x128xf32>
    %83 = math.tanh %82 : vector<8x128xf32>
    %84 = arith.mulf %80, %66 : vector<8x128xf32>
    %85 = arith.mulf %79, %83 : vector<8x128xf32>
    %86 = arith.addf %84, %85 : vector<8x128xf32>
    %87 = math.tanh %86 : vector<8x128xf32>
    %88 = arith.mulf %81, %87 : vector<8x128xf32>
    %c0_i32_16 = arith.constant 0 : i32
    %89 = vector.broadcast %c0_i32_16 : i32 to vector<1x128xi32>
    %90 = arith.cmpi sge, %9, %89 : vector<1x128xi32>
    %c96_i32 = arith.constant 96 : i32
    %91 = vector.broadcast %c96_i32 : i32 to vector<1x128xi32>
    %92 = arith.cmpi slt, %9, %91 : vector<1x128xi32>
    %93 = arith.andi %90, %92 : vector<1x128xi1>
    %94 = vector.shape_cast %93 : vector<1x128xi1> to vector<1x128xi1>
    %95 = vector.broadcast %94 : vector<1x128xi1> to vector<8x128xi1>
    %96 = arith.select %95, %86, %66 : vector<8x128xi1>, vector<8x128xf32>
    %97 = vector.shape_cast %93 : vector<1x128xi1> to vector<1x128xi1>
    %98 = vector.broadcast %97 : vector<1x128xi1> to vector<8x128xi1>
    %99 = arith.select %98, %88, %69 : vector<8x128xi1>, vector<8x128xf32>
    %cst_17 = arith.constant dense<0.000000e+00> : vector<8x512xf32>
    %100 = tpu.matmul %99, %6, %cst_17 {dimension_numbers = #tpu.dot_dimension_numbers<[1], [0], [0], [1], [0, 0, 1, 1], [], []>} : vector<8x128xf32>, vector<128x512xf32>, vector<8x512xf32> -> vector<8x512xf32>
    %101 = vector.extract_strided_slice %5 {offsets = [24, 0], sizes = [8, 512], strides = [1, 1]} : vector<64x512xf32> to vector<8x512xf32>
    %102 = arith.addf %100, %101 : vector<8x512xf32>
    %103 = vector.extract_strided_slice %102 {offsets = [0, 0], sizes = [8, 384], strides = [1, 1]} : vector<8x512xf32> to vector<8x384xf32>
    %104 = arith.negf %103 : vector<8x384xf32>
    %105 = math.exp %104 : vector<8x384xf32>
    %cst_18 = arith.constant 1.000000e+00 : f32
    %106 = vector.broadcast %cst_18 : f32 to vector<8x384xf32>
    %107 = arith.addf %106, %105 : vector<8x384xf32>
    %108 = arith.divf %106, %107 : vector<8x384xf32>
    %109 = vector.extract_strided_slice %108 {offsets = [0, 0], sizes = [8, 128], strides = [1, 1]} : vector<8x384xf32> to vector<8x128xf32>
    %110 = vector.extract_strided_slice %108 {offsets = [0, 128], sizes = [8, 128], strides = [1, 1]} : vector<8x384xf32> to vector<8x128xf32>
    %111 = vector.extract_strided_slice %108 {offsets = [0, 256], sizes = [8, 128], strides = [1, 1]} : vector<8x384xf32> to vector<8x128xf32>
    %112 = vector.extract_strided_slice %102 {offsets = [0, 384], sizes = [8, 128], strides = [1, 1]} : vector<8x512xf32> to vector<8x128xf32>
    %113 = math.tanh %112 : vector<8x128xf32>
    %114 = arith.mulf %110, %96 : vector<8x128xf32>
    %115 = arith.mulf %109, %113 : vector<8x128xf32>
    %116 = arith.addf %114, %115 : vector<8x128xf32>
    %117 = math.tanh %116 : vector<8x128xf32>
    %118 = arith.mulf %111, %117 : vector<8x128xf32>
    %cst_19 = arith.constant dense<0.000000e+00> : vector<8x512xf32>
    %119 = tpu.matmul %118, %6, %cst_19 {dimension_numbers = #tpu.dot_dimension_numbers<[1], [0], [0], [1], [0, 0, 1, 1], [], []>} : vector<8x128xf32>, vector<128x512xf32>, vector<8x512xf32> -> vector<8x512xf32>
    %120 = vector.extract_strided_slice %5 {offsets = [32, 0], sizes = [8, 512], strides = [1, 1]} : vector<64x512xf32> to vector<8x512xf32>
    %121 = arith.addf %119, %120 : vector<8x512xf32>
    %122 = vector.extract_strided_slice %121 {offsets = [0, 0], sizes = [8, 384], strides = [1, 1]} : vector<8x512xf32> to vector<8x384xf32>
    %123 = arith.negf %122 : vector<8x384xf32>
    %124 = math.exp %123 : vector<8x384xf32>
    %cst_20 = arith.constant 1.000000e+00 : f32
    %125 = vector.broadcast %cst_20 : f32 to vector<8x384xf32>
    %126 = arith.addf %125, %124 : vector<8x384xf32>
    %127 = arith.divf %125, %126 : vector<8x384xf32>
    %128 = vector.extract_strided_slice %127 {offsets = [0, 0], sizes = [8, 128], strides = [1, 1]} : vector<8x384xf32> to vector<8x128xf32>
    %129 = vector.extract_strided_slice %127 {offsets = [0, 128], sizes = [8, 128], strides = [1, 1]} : vector<8x384xf32> to vector<8x128xf32>
    %130 = vector.extract_strided_slice %127 {offsets = [0, 256], sizes = [8, 128], strides = [1, 1]} : vector<8x384xf32> to vector<8x128xf32>
    %131 = vector.extract_strided_slice %121 {offsets = [0, 384], sizes = [8, 128], strides = [1, 1]} : vector<8x512xf32> to vector<8x128xf32>
    %132 = math.tanh %131 : vector<8x128xf32>
    %133 = arith.mulf %129, %116 : vector<8x128xf32>
    %134 = arith.mulf %128, %132 : vector<8x128xf32>
    %135 = arith.addf %133, %134 : vector<8x128xf32>
    %136 = math.tanh %135 : vector<8x128xf32>
    %137 = arith.mulf %130, %136 : vector<8x128xf32>
    %cst_21 = arith.constant dense<0.000000e+00> : vector<8x512xf32>
    %138 = tpu.matmul %137, %6, %cst_21 {dimension_numbers = #tpu.dot_dimension_numbers<[1], [0], [0], [1], [0, 0, 1, 1], [], []>} : vector<8x128xf32>, vector<128x512xf32>, vector<8x512xf32> -> vector<8x512xf32>
    %139 = vector.extract_strided_slice %5 {offsets = [40, 0], sizes = [8, 512], strides = [1, 1]} : vector<64x512xf32> to vector<8x512xf32>
    %140 = arith.addf %138, %139 : vector<8x512xf32>
    %141 = vector.extract_strided_slice %140 {offsets = [0, 0], sizes = [8, 384], strides = [1, 1]} : vector<8x512xf32> to vector<8x384xf32>
    %142 = arith.negf %141 : vector<8x384xf32>
    %143 = math.exp %142 : vector<8x384xf32>
    %cst_22 = arith.constant 1.000000e+00 : f32
    %144 = vector.broadcast %cst_22 : f32 to vector<8x384xf32>
    %145 = arith.addf %144, %143 : vector<8x384xf32>
    %146 = arith.divf %144, %145 : vector<8x384xf32>
    %147 = vector.extract_strided_slice %146 {offsets = [0, 0], sizes = [8, 128], strides = [1, 1]} : vector<8x384xf32> to vector<8x128xf32>
    %148 = vector.extract_strided_slice %146 {offsets = [0, 128], sizes = [8, 128], strides = [1, 1]} : vector<8x384xf32> to vector<8x128xf32>
    %149 = vector.extract_strided_slice %146 {offsets = [0, 256], sizes = [8, 128], strides = [1, 1]} : vector<8x384xf32> to vector<8x128xf32>
    %150 = vector.extract_strided_slice %140 {offsets = [0, 384], sizes = [8, 128], strides = [1, 1]} : vector<8x512xf32> to vector<8x128xf32>
    %151 = math.tanh %150 : vector<8x128xf32>
    %152 = arith.mulf %148, %135 : vector<8x128xf32>
    %153 = arith.mulf %147, %151 : vector<8x128xf32>
    %154 = arith.addf %152, %153 : vector<8x128xf32>
    %155 = math.tanh %154 : vector<8x128xf32>
    %156 = arith.mulf %149, %155 : vector<8x128xf32>
    %cst_23 = arith.constant dense<0.000000e+00> : vector<8x512xf32>
    %157 = tpu.matmul %156, %6, %cst_23 {dimension_numbers = #tpu.dot_dimension_numbers<[1], [0], [0], [1], [0, 0, 1, 1], [], []>} : vector<8x128xf32>, vector<128x512xf32>, vector<8x512xf32> -> vector<8x512xf32>
    %158 = vector.extract_strided_slice %5 {offsets = [48, 0], sizes = [8, 512], strides = [1, 1]} : vector<64x512xf32> to vector<8x512xf32>
    %159 = arith.addf %157, %158 : vector<8x512xf32>
    %160 = vector.extract_strided_slice %159 {offsets = [0, 0], sizes = [8, 384], strides = [1, 1]} : vector<8x512xf32> to vector<8x384xf32>
    %161 = arith.negf %160 : vector<8x384xf32>
    %162 = math.exp %161 : vector<8x384xf32>
    %cst_24 = arith.constant 1.000000e+00 : f32
    %163 = vector.broadcast %cst_24 : f32 to vector<8x384xf32>
    %164 = arith.addf %163, %162 : vector<8x384xf32>
    %165 = arith.divf %163, %164 : vector<8x384xf32>
    %166 = vector.extract_strided_slice %165 {offsets = [0, 0], sizes = [8, 128], strides = [1, 1]} : vector<8x384xf32> to vector<8x128xf32>
    %167 = vector.extract_strided_slice %165 {offsets = [0, 128], sizes = [8, 128], strides = [1, 1]} : vector<8x384xf32> to vector<8x128xf32>
    %168 = vector.extract_strided_slice %165 {offsets = [0, 256], sizes = [8, 128], strides = [1, 1]} : vector<8x384xf32> to vector<8x128xf32>
    %169 = vector.extract_strided_slice %159 {offsets = [0, 384], sizes = [8, 128], strides = [1, 1]} : vector<8x512xf32> to vector<8x128xf32>
    %170 = math.tanh %169 : vector<8x128xf32>
    %171 = arith.mulf %167, %154 : vector<8x128xf32>
    %172 = arith.mulf %166, %170 : vector<8x128xf32>
    %173 = arith.addf %171, %172 : vector<8x128xf32>
    %174 = math.tanh %173 : vector<8x128xf32>
    %175 = arith.mulf %168, %174 : vector<8x128xf32>
    %cst_25 = arith.constant dense<0.000000e+00> : vector<8x512xf32>
    %176 = tpu.matmul %175, %6, %cst_25 {dimension_numbers = #tpu.dot_dimension_numbers<[1], [0], [0], [1], [0, 0, 1, 1], [], []>} : vector<8x128xf32>, vector<128x512xf32>, vector<8x512xf32> -> vector<8x512xf32>
    %177 = vector.extract_strided_slice %5 {offsets = [56, 0], sizes = [8, 512], strides = [1, 1]} : vector<64x512xf32> to vector<8x512xf32>
    %178 = arith.addf %176, %177 : vector<8x512xf32>
    %179 = vector.extract_strided_slice %178 {offsets = [0, 0], sizes = [8, 384], strides = [1, 1]} : vector<8x512xf32> to vector<8x384xf32>
    %180 = arith.negf %179 : vector<8x384xf32>
    %181 = math.exp %180 : vector<8x384xf32>
    %cst_26 = arith.constant 1.000000e+00 : f32
    %182 = vector.broadcast %cst_26 : f32 to vector<8x384xf32>
    %183 = arith.addf %182, %181 : vector<8x384xf32>
    %184 = arith.divf %182, %183 : vector<8x384xf32>
    %185 = vector.extract_strided_slice %184 {offsets = [0, 0], sizes = [8, 128], strides = [1, 1]} : vector<8x384xf32> to vector<8x128xf32>
    %186 = vector.extract_strided_slice %184 {offsets = [0, 128], sizes = [8, 128], strides = [1, 1]} : vector<8x384xf32> to vector<8x128xf32>
    %187 = vector.extract_strided_slice %184 {offsets = [0, 256], sizes = [8, 128], strides = [1, 1]} : vector<8x384xf32> to vector<8x128xf32>
    %188 = vector.extract_strided_slice %178 {offsets = [0, 384], sizes = [8, 128], strides = [1, 1]} : vector<8x512xf32> to vector<8x128xf32>
    %189 = math.tanh %188 : vector<8x128xf32>
    %190 = arith.mulf %186, %173 : vector<8x128xf32>
    %191 = arith.mulf %185, %189 : vector<8x128xf32>
    %192 = arith.addf %190, %191 : vector<8x128xf32>
    %193 = math.tanh %192 : vector<8x128xf32>
    %194 = arith.mulf %187, %193 : vector<8x128xf32>
    %cst_27 = arith.constant dense<0.000000e+00> : vector<8x512xf32>
    %195 = tpu.matmul %194, %6, %cst_27 {dimension_numbers = #tpu.dot_dimension_numbers<[1], [0], [0], [1], [0, 0, 1, 1], [], []>} : vector<8x128xf32>, vector<128x512xf32>, vector<8x512xf32> -> vector<8x512xf32>
    %196 = vector.extract_strided_slice %5 {offsets = [56, 0], sizes = [8, 512], strides = [1, 1]} : vector<64x512xf32> to vector<8x512xf32>
    %197 = arith.addf %195, %196 : vector<8x512xf32>
    %198 = vector.extract_strided_slice %197 {offsets = [0, 0], sizes = [8, 384], strides = [1, 1]} : vector<8x512xf32> to vector<8x384xf32>
    %199 = arith.negf %198 : vector<8x384xf32>
    %200 = math.exp %199 : vector<8x384xf32>
    %cst_28 = arith.constant 1.000000e+00 : f32
    %201 = vector.broadcast %cst_28 : f32 to vector<8x384xf32>
    %202 = arith.addf %201, %200 : vector<8x384xf32>
    %203 = arith.divf %201, %202 : vector<8x384xf32>
    %204 = vector.extract_strided_slice %203 {offsets = [0, 0], sizes = [8, 128], strides = [1, 1]} : vector<8x384xf32> to vector<8x128xf32>
    %205 = vector.extract_strided_slice %203 {offsets = [0, 128], sizes = [8, 128], strides = [1, 1]} : vector<8x384xf32> to vector<8x128xf32>
    %206 = vector.extract_strided_slice %203 {offsets = [0, 256], sizes = [8, 128], strides = [1, 1]} : vector<8x384xf32> to vector<8x128xf32>
    %207 = vector.extract_strided_slice %197 {offsets = [0, 384], sizes = [8, 128], strides = [1, 1]} : vector<8x512xf32> to vector<8x128xf32>
    %208 = math.tanh %207 : vector<8x128xf32>
    %209 = arith.mulf %205, %192 : vector<8x128xf32>
    %210 = arith.mulf %204, %208 : vector<8x128xf32>
    %211 = arith.addf %209, %210 : vector<8x128xf32>
    %212 = math.tanh %211 : vector<8x128xf32>
    %213 = arith.mulf %206, %212 : vector<8x128xf32>
    %c32_i32_29 = arith.constant 32 : i32
    %214 = vector.broadcast %c32_i32_29 : i32 to vector<1x128xi32>
    %215 = arith.cmpi sge, %9, %214 : vector<1x128xi32>
    %c128_i32 = arith.constant 128 : i32
    %216 = vector.broadcast %c128_i32 : i32 to vector<1x128xi32>
    %217 = arith.cmpi slt, %9, %216 : vector<1x128xi32>
    %218 = arith.andi %215, %217 : vector<1x128xi1>
    %219 = vector.shape_cast %218 : vector<1x128xi1> to vector<1x128xi1>
    %220 = vector.broadcast %219 : vector<1x128xi1> to vector<8x128xi1>
    %221 = arith.select %220, %211, %192 : vector<8x128xi1>, vector<8x128xf32>
    %222 = vector.shape_cast %218 : vector<1x128xi1> to vector<1x128xi1>
    %223 = vector.broadcast %222 : vector<1x128xi1> to vector<8x128xi1>
    %224 = arith.select %223, %213, %194 : vector<8x128xi1>, vector<8x128xf32>
    %cst_30 = arith.constant dense<0.000000e+00> : vector<8x512xf32>
    %225 = tpu.matmul %224, %6, %cst_30 {dimension_numbers = #tpu.dot_dimension_numbers<[1], [0], [0], [1], [0, 0, 1, 1], [], []>} : vector<8x128xf32>, vector<128x512xf32>, vector<8x512xf32> -> vector<8x512xf32>
    %226 = vector.extract_strided_slice %5 {offsets = [56, 0], sizes = [8, 512], strides = [1, 1]} : vector<64x512xf32> to vector<8x512xf32>
    %227 = arith.addf %225, %226 : vector<8x512xf32>
    %228 = vector.extract_strided_slice %227 {offsets = [0, 0], sizes = [8, 384], strides = [1, 1]} : vector<8x512xf32> to vector<8x384xf32>
    %229 = arith.negf %228 : vector<8x384xf32>
    %230 = math.exp %229 : vector<8x384xf32>
    %cst_31 = arith.constant 1.000000e+00 : f32
    %231 = vector.broadcast %cst_31 : f32 to vector<8x384xf32>
    %232 = arith.addf %231, %230 : vector<8x384xf32>
    %233 = arith.divf %231, %232 : vector<8x384xf32>
    %234 = vector.extract_strided_slice %233 {offsets = [0, 0], sizes = [8, 128], strides = [1, 1]} : vector<8x384xf32> to vector<8x128xf32>
    %235 = vector.extract_strided_slice %233 {offsets = [0, 128], sizes = [8, 128], strides = [1, 1]} : vector<8x384xf32> to vector<8x128xf32>
    %236 = vector.extract_strided_slice %233 {offsets = [0, 256], sizes = [8, 128], strides = [1, 1]} : vector<8x384xf32> to vector<8x128xf32>
    %237 = vector.extract_strided_slice %227 {offsets = [0, 384], sizes = [8, 128], strides = [1, 1]} : vector<8x512xf32> to vector<8x128xf32>
    %238 = math.tanh %237 : vector<8x128xf32>
    %239 = arith.mulf %235, %221 : vector<8x128xf32>
    %240 = arith.mulf %234, %238 : vector<8x128xf32>
    %241 = arith.addf %239, %240 : vector<8x128xf32>
    %242 = math.tanh %241 : vector<8x128xf32>
    %243 = arith.mulf %236, %242 : vector<8x128xf32>
    %c64_i32_32 = arith.constant 64 : i32
    %244 = vector.broadcast %c64_i32_32 : i32 to vector<1x128xi32>
    %245 = arith.cmpi sge, %9, %244 : vector<1x128xi32>
    %c128_i32_33 = arith.constant 128 : i32
    %246 = vector.broadcast %c128_i32_33 : i32 to vector<1x128xi32>
    %247 = arith.cmpi slt, %9, %246 : vector<1x128xi32>
    %248 = arith.andi %245, %247 : vector<1x128xi1>
    %249 = vector.shape_cast %248 : vector<1x128xi1> to vector<1x128xi1>
    %250 = vector.broadcast %249 : vector<1x128xi1> to vector<8x128xi1>
    %251 = arith.select %250, %241, %221 : vector<8x128xi1>, vector<8x128xf32>
    %252 = vector.shape_cast %248 : vector<1x128xi1> to vector<1x128xi1>
    %253 = vector.broadcast %252 : vector<1x128xi1> to vector<8x128xi1>
    %254 = arith.select %253, %243, %224 : vector<8x128xi1>, vector<8x128xf32>
    %cst_34 = arith.constant dense<0.000000e+00> : vector<8x512xf32>
    %255 = tpu.matmul %254, %6, %cst_34 {dimension_numbers = #tpu.dot_dimension_numbers<[1], [0], [0], [1], [0, 0, 1, 1], [], []>} : vector<8x128xf32>, vector<128x512xf32>, vector<8x512xf32> -> vector<8x512xf32>
    %256 = vector.extract_strided_slice %5 {offsets = [56, 0], sizes = [8, 512], strides = [1, 1]} : vector<64x512xf32> to vector<8x512xf32>
    %257 = arith.addf %255, %256 : vector<8x512xf32>
    %258 = vector.extract_strided_slice %257 {offsets = [0, 0], sizes = [8, 384], strides = [1, 1]} : vector<8x512xf32> to vector<8x384xf32>
    %259 = arith.negf %258 : vector<8x384xf32>
    %260 = math.exp %259 : vector<8x384xf32>
    %cst_35 = arith.constant 1.000000e+00 : f32
    %261 = vector.broadcast %cst_35 : f32 to vector<8x384xf32>
    %262 = arith.addf %261, %260 : vector<8x384xf32>
    %263 = arith.divf %261, %262 : vector<8x384xf32>
    %264 = vector.extract_strided_slice %263 {offsets = [0, 0], sizes = [8, 128], strides = [1, 1]} : vector<8x384xf32> to vector<8x128xf32>
    %265 = vector.extract_strided_slice %263 {offsets = [0, 128], sizes = [8, 128], strides = [1, 1]} : vector<8x384xf32> to vector<8x128xf32>
    %266 = vector.extract_strided_slice %263 {offsets = [0, 256], sizes = [8, 128], strides = [1, 1]} : vector<8x384xf32> to vector<8x128xf32>
    %267 = vector.extract_strided_slice %257 {offsets = [0, 384], sizes = [8, 128], strides = [1, 1]} : vector<8x512xf32> to vector<8x128xf32>
    %268 = math.tanh %267 : vector<8x128xf32>
    %269 = arith.mulf %265, %251 : vector<8x128xf32>
    %270 = arith.mulf %264, %268 : vector<8x128xf32>
    %271 = arith.addf %269, %270 : vector<8x128xf32>
    %272 = math.tanh %271 : vector<8x128xf32>
    %273 = arith.mulf %266, %272 : vector<8x128xf32>
    %c96_i32_36 = arith.constant 96 : i32
    %274 = vector.broadcast %c96_i32_36 : i32 to vector<1x128xi32>
    %275 = arith.cmpi sge, %9, %274 : vector<1x128xi32>
    %c128_i32_37 = arith.constant 128 : i32
    %276 = vector.broadcast %c128_i32_37 : i32 to vector<1x128xi32>
    %277 = arith.cmpi slt, %9, %276 : vector<1x128xi32>
    %278 = arith.andi %275, %277 : vector<1x128xi1>
    %279 = vector.shape_cast %278 : vector<1x128xi1> to vector<1x128xi1>
    %280 = vector.broadcast %279 : vector<1x128xi1> to vector<8x128xi1>
    %281 = arith.select %280, %273, %254 : vector<8x128xi1>, vector<8x128xf32>
    %c0_38 = arith.constant 0 : index
    %c0_39 = arith.constant 0 : index
    %282 = vector.load %arg4[%c0_38, %c0_39] : memref<128x64xf32, #tpu.memory_space<vmem>>, vector<128x64xf32>
    %cst_40 = arith.constant dense<0.000000e+00> : vector<8x64xf32>
    %283 = tpu.matmul %281, %282, %cst_40 {dimension_numbers = #tpu.dot_dimension_numbers<[1], [0], [0], [1], [0, 0, 1, 1], [], []>} : vector<8x128xf32>, vector<128x64xf32>, vector<8x64xf32> -> vector<8x64xf32>
    %c0_41 = arith.constant 0 : index
    %c0_42 = arith.constant 0 : index
    %284 = vector.load %arg5[%c0_41, %c0_42] : memref<1x64xf32, #tpu.memory_space<vmem>>, vector<1x64xf32>
    %285 = vector.broadcast %284 : vector<1x64xf32> to vector<8x64xf32>
    %286 = arith.addf %283, %285 : vector<8x64xf32>
    %cst_43 = arith.constant 0.000000e+00 : f32
    %287 = vector.broadcast %cst_43 : f32 to vector<8x64xf32>
    %288 = arith.maximumf %286, %287 : vector<8x64xf32>
    %c0_44 = arith.constant 0 : index
    %c0_45 = arith.constant 0 : index
    %289 = vector.load %arg6[%c0_44, %c0_45] : memref<64x32xf32, #tpu.memory_space<vmem>>, vector<64x32xf32>
    %cst_46 = arith.constant dense<0.000000e+00> : vector<8x32xf32>
    %290 = tpu.matmul %288, %289, %cst_46 {dimension_numbers = #tpu.dot_dimension_numbers<[1], [0], [0], [1], [0, 0, 1, 1], [], []>} : vector<8x64xf32>, vector<64x32xf32>, vector<8x32xf32> -> vector<8x32xf32>
    %c0_47 = arith.constant 0 : index
    %c0_48 = arith.constant 0 : index
    %291 = vector.load %arg7[%c0_47, %c0_48] : memref<1x32xf32, #tpu.memory_space<vmem>>, vector<1x32xf32>
    %292 = vector.broadcast %291 : vector<1x32xf32> to vector<8x32xf32>
    %293 = arith.addf %290, %292 : vector<8x32xf32>
    %cst_49 = arith.constant 0.000000e+00 : f32
    %294 = vector.broadcast %cst_49 : f32 to vector<8x32xf32>
    %295 = arith.maximumf %293, %294 : vector<8x32xf32>
    %c0_50 = arith.constant 0 : index
    %c0_51 = arith.constant 0 : index
    %296 = vector.load %arg8[%c0_50, %c0_51] : memref<32x5xf32, #tpu.memory_space<vmem>>, vector<32x5xf32>
    %cst_52 = arith.constant dense<0.000000e+00> : vector<8x5xf32>
    %297 = tpu.matmul %295, %296, %cst_52 {dimension_numbers = #tpu.dot_dimension_numbers<[1], [0], [0], [1], [0, 0, 1, 1], [], []>} : vector<8x32xf32>, vector<32x5xf32>, vector<8x5xf32> -> vector<8x5xf32>
    %c0_53 = arith.constant 0 : index
    %c0_54 = arith.constant 0 : index
    %298 = vector.load %arg9[%c0_53, %c0_54] : memref<1x5xf32, #tpu.memory_space<vmem>>, vector<1x5xf32>
    %299 = vector.broadcast %298 : vector<1x5xf32> to vector<8x5xf32>
    %300 = arith.addf %297, %299 : vector<8x5xf32>
    %c0_55 = arith.constant 0 : index
    %c0_56 = arith.constant 0 : index
    %301 = vector.load %arg10[%c0_55, %c0_56] : memref<8x5xf32, #tpu.memory_space<vmem>>, vector<8x5xf32>
    tpu.vector_store %arg10[%c0_55, %c0_56], %300 {strides = array<i32>} : memref<8x5xf32, #tpu.memory_space<vmem>>, vector<8x5xf32>,
    return
  }
}

</mosaic_0001>

<bundles_post_ra>
// kernel: maneuver_forward.1
= control target key start
LH: loop header
LB: loop body
LE: loop exit
PB: predicated region body
PF: predicated region fallthrough
CT: control target
= control target key end

     0   :  { %v3720_v7 = vmov 0.0   ;;  %vm82_vm0 = vcmask 261120   ;;  %s4790_s0 = inlined_call_operand.vmem [shape: f32[64,32], index: 0, kind: input, shape index: {}]   ;;  %s4791_s1 = inlined_call_operand.vmem [shape: f32[32,512], index: 1, kind: input, shape index: {}]   ;;  %s4792_s2 = inlined_call_operand.vmem [shape: f32[128,512], index: 2, kind: input, shape index: {}]   ;;  %s4793_s3 = inlined_call_operand.vmem [shape: f32[1,512], index: 3, kind: input, shape index: {}]   ;;  %s4794_s4 = inlined_call_operand.vmem [shape: f32[128,64], index: 4, kind: input, shape index: {}]   ;;  %s4795_s5 = inlined_call_operand.vmem [shape: f32[1,64], index: 5, kind: input, shape index: {}]   ;;  %s4796_s6 = inlined_call_operand.vmem [shape: f32[64,32], index: 6, kind: input, shape index: {}]   ;;  %s4797_s7 = inlined_call_operand.vmem [shape: f32[1,32], index: 7, kind: input, shape index: {}]   ;;  %s4798_s8 = inlined_call_operand.vmem [shape: f32[32,5], index: 8, kind: input, shape index: {}]   ;;  %s4799_s9 = inlined_call_operand.vmem [shape: f32[1,5], index: 9, kind: input, shape index: {}]   ;;  %s4800_s10 = inlined_call_operand.hbm [shape: f32[8,5], index: 10, kind: output, shape index: {}]  }
   0x1   :  { %v45_v0 = vld [vmem:[%s4791_s1 + $0x8] sm:$0xff]  ;;  %v47_v2 = vld [vmem:[%s4791_s1 + $0x18] sm:$0xff]  ;;  %v44_v5 = vld [vmem:[%s4791_s1] sm:$0xff]  ;;  %171 = vmatprep.mubr.f32.mxu0 %v3720_v7  ;;  %284 = vmatprep.mubr.f32.mxu1 %v3720_v7 }
   0x2   :  { %v49_v1 = vld [vmem:[%s4791_s1 + $0x28] sm:$0xff]  ;;  %v51_v4 = vld [vmem:[%s4791_s1 + $0x38] sm:$0xff]  ;;  %v48_v6 = vld [vmem:[%s4791_s1 + $0x20] sm:$0xff] }
   0x3   :  { %v2698_v3 = vpack.c.bf16 %v49_v1, %v45_v0  ;;  %v2706_v8 = vpack.c.bf16 %v51_v4, %v47_v2  ;;  %v2700_v9 = vpack.c.bf16 %v48_v6, %v44_v5  ;;  %v46_v10 = vld [vmem:[%s4791_s1 + $0x10] sm:$0xff]  ;;  %v53_v12 = vld [vmem:[%s4791_s1 + $0x48] sm:$0xff]  ;;  %v55_v15 = vld [vmem:[%s4791_s1 + $0x58] sm:$0xff] }
   0x4   :  { %v50_v11 = vld [vmem:[%s4791_s1 + $0x30] sm:$0xff]  ;;  %v57_v14 = vld [vmem:[%s4791_s1 + $0x68] sm:$0xff]  ;;  %v59_v16 = vld [vmem:[%s4791_s1 + $0x78] sm:$0xff] }
   0x5   :  { %2699 = vmatprep.subr.bf16.mxu0 %v2698_v3  ;;  %v2708_v13 = vpack.c.bf16 %v50_v11, %v46_v10  ;;  %2707 = vmatprep.subr.bf16.mxu1 %v2706_v8  ;;  %v2702_v17 = vpack.c.bf16 %v57_v14, %v53_v12  ;;  %v2710_v18 = vpack.c.bf16 %v59_v16, %v55_v15  ;;  %v52_v19 = vld [vmem:[%s4791_s1 + $0x40] sm:$0xff]  ;;  %v54_v21 = vld [vmem:[%s4791_s1 + $0x50] sm:$0xff]  ;;  %v334_v24 = vld [vmem:[%s4792_s2 + $0x8] sm:$0xff] }
   0x6   :  { %2701 = vmatpush1.bf16.msra.mxu0 %v2700_v9  ;;  %v56_v20 = vld [vmem:[%s4791_s1 + $0x60] sm:$0xff]  ;;  %v58_v23 = vld [vmem:[%s4791_s1 + $0x70] sm:$0xff]  ;;  %v338_v26 = vld [vmem:[%s4792_s2 + $0x28] sm:$0xff] }
   0x7   :  { %2709 = vmatpush1.bf16.msra.mxu1 %v2708_v13  ;;  %v2704_v22 = vpack.c.bf16 %v56_v20, %v52_v19  ;;  %2703 = vmatprep.subr.bf16.mxu0 %v2702_v17  ;;  %v2712_v25 = vpack.c.bf16 %v58_v23, %v54_v21  ;;  %v336_v27 = vld [vmem:[%s4792_s2 + $0x18] sm:$0xff]  ;;  %v3841_v29 = vpack.c.bf16 %v338_v26, %v334_v24  ;;  %v333_v31 = vld [vmem:[%s4792_s2] sm:$0xff]  ;;  %v335_v33 = vld [vmem:[%s4792_s2 + $0x10] sm:$0xff] }
   0x8   :  { %2711 = vmatprep.subr.bf16.mxu1 %v2710_v18  ;;  %v340_v28 = vld [vmem:[%s4792_s2 + $0x38] sm:$0xff]  ;;  %v337_v32 = vld [vmem:[%s4792_s2 + $0x20] sm:$0xff]  ;;  %v339_v36 = vld [vmem:[%s4792_s2 + $0x30] sm:$0xff] }
   0x9   :  { %v3843_v30 = vpack.c.bf16 %v340_v28, %v336_v27  ;;  %v36_v34 = vld [vmem:[%s4790_s0] sm:$0xff]  ;;  %v3857_v35 = vpack.c.bf16 %v337_v32, %v333_v31  ;;  %v342_v37 = vld [vmem:[%s4792_s2 + $0x48] sm:$0xff]  ;;  %v3866_v38 = vpack.c.bf16 %v339_v36, %v335_v33  ;;  %v344_v40 = vld [vmem:[%s4792_s2 + $0x58] sm:$0xff] }
   0xa   :  { %2705 = vmatpush1.bf16.msra.mxu0 %v2704_v22  ;;  %v346_v39 = vld [vmem:[%s4792_s2 + $0x68] sm:$0xff]  ;;  %v348_v41 = vld [vmem:[%s4792_s2 + $0x78] sm:$0xff]  ;;  %v341_v43 = vld [vmem:[%s4792_s2 + $0x40] sm:$0xff] }
   0xb   :  { %2713 = vmatpush1.bf16.msra.mxu1 %v2712_v25  ;;  %2715 = vmatprep.subr.bf16.mxu0 %v3841_v29  ;;  %v3878_v42 = vpack.c.bf16 %v346_v39, %v342_v37  ;;  %v345_v44 = vld [vmem:[%s4792_s2 + $0x60] sm:$0xff]  ;;  %v343_v45 = vld [vmem:[%s4792_s2 + $0x50] sm:$0xff]  ;;  %v37_v46 = vld [vmem:[%s4790_s0 + $0x8] sm:$0xff]  ;;  %v3893_v47 = vpack.c.bf16 %v348_v41, %v344_v40 }
   0xc   :  { %2747 = vmatprep.subr.bf16.mxu1 %v3843_v30  ;;  %v347_v48 = vld [vmem:[%s4792_s2 + $0x70] sm:$0xff]  ;;  %v350_v49 = vld [vmem:[%s4792_s2 + $0x88] sm:$0xff]  ;;  %v3903_v50 = vpack.c.bf16 %v345_v44, %v341_v43  ;;  %v352_v52 = vld [vmem:[%s4792_s2 + $0x98] sm:$0xff] }
   0xd   :  { %2546 = vmatmul.mubr.msk.f32.vlgmr.msra.gmra.mrb[0].mxu0 %vm82_vm0, %v36_v34  ;;  %v354_v51 = vld [vmem:[%s4792_s2 + $0xa8] sm:$0xff]  ;;  %v356_v53 = vld [vmem:[%s4792_s2 + $0xb8] sm:$0xff]  ;;  %v3916_v54 = vpack.c.bf16 %v347_v48, %v343_v45  ;;  %v349_v55 = vld [vmem:[%s4792_s2 + $0x80] sm:$0xff] }
   0xe   :  { %2554 = vmatmul.mubr.msk.f32.vlgmr.msra.gmra.mrb[0].mxu1 %vm82_vm0, %v36_v34  ;;  %2717 = vmatpush1.bf16.msra.mxu0 %v3857_v35  ;;  %v353_v56 = vld [vmem:[%s4792_s2 + $0xa0] sm:$0xff]  ;;  %v3926_v57 = vpack.c.bf16 %v354_v51, %v350_v49  ;;  %v351_v58 = vld [vmem:[%s4792_s2 + $0x90] sm:$0xff]  ;;  %v3936_v60 = vpack.c.bf16 %v356_v53, %v352_v52  ;;  %v358_v61 = vld [vmem:[%s4792_s2 + $0xc8] sm:$0xff] }
   0xf   :  { %2749 = vmatpush1.bf16.msra.mxu1 %v3866_v38  ;;  %177 = vmatprep.mubr.f32.mxu0 %v3720_v7  ;;  %v355_v59 = vld [vmem:[%s4792_s2 + $0xb0] sm:$0xff]  ;;  %v362_v62 = vld [vmem:[%s4792_s2 + $0xe8] sm:$0xff]  ;;  %v3949_v0 = vpack.c.bf16 %v353_v56, %v349_v55  ;;  %v360_v1 = vld [vmem:[%s4792_s2 + $0xd8] sm:$0xff] }
  0x10   :  { %290 = vmatprep.mubr.f32.mxu1 %v3720_v7  ;;  %2719 = vmatprep.subr.bf16.mxu0 %v3878_v42  ;;  %v38_v63 = vld [vmem:[%s4790_s0 + $0x10] sm:$0xff]  ;;  %v364_v2 = vld [vmem:[%s4792_s2 + $0xf8] sm:$0xff]  ;;  %v3959_v3 = vpack.c.bf16 %v355_v59, %v351_v58  ;;  %v357_v4 = vld [vmem:[%s4792_s2 + $0xc0] sm:$0xff]  ;;  %v3969_v6 = vpack.c.bf16 %v362_v62, %v358_v61 }
  0x11   :  { %2547 = vmatmul.mubr.msk.f32.gmra.mrb[2].mxu0 %vm82_vm0, %v37_v46  ;;  %2751 = vmatprep.subr.bf16.mxu1 %v3893_v47  ;;  %v361_v5 = vld [vmem:[%s4792_s2 + $0xe0] sm:$0xff]  ;;  %v359_v8 = vld [vmem:[%s4792_s2 + $0xd0] sm:$0xff]  ;;  %v3979_v10 = vpack.c.bf16 %v364_v2, %v360_v1  ;;  %v366_v11 = vld [vmem:[%s4792_s2 + $0x108] sm:$0xff] }
  0x12   :  { %2555 = vmatmul.mubr.msk.f32.gmra.mrb[2].mxu1 %vm82_vm0, %v37_v46  ;;  %2721 = vmatpush1.bf16.msra.mxu0 %v3903_v50  ;;  %v363_v9 = vld [vmem:[%s4792_s2 + $0xf0] sm:$0xff]  ;;  %v370_v12 = vld [vmem:[%s4792_s2 + $0x128] sm:$0xff]  ;;  %v39_v13 = vld [vmem:[%s4790_s0 + $0x18] sm:$0xff]  ;;  %v3992_v14 = vpack.c.bf16 %v361_v5, %v357_v4 }
  0x13   :  { %2753 = vmatpush1.bf16.msra.mxu1 %v3916_v54  ;;  %183 = vmatprep.mubr.f32.mxu0 %v3720_v7  ;;  %v368_v15 = vld [vmem:[%s4792_s2 + $0x118] sm:$0xff]  ;;  %v4002_v17 = vpack.c.bf16 %v363_v9, %v359_v8  ;;  %v365_v18 = vld [vmem:[%s4792_s2 + $0x100] sm:$0xff]  ;;  %v4012_v20 = vpack.c.bf16 %v370_v12, %v366_v11  ;;  %v367_v21 = vld [vmem:[%s4792_s2 + $0x110] sm:$0xff] }
  0x14   :  { %296 = vmatprep.mubr.f32.mxu1 %v3720_v7  ;;  %2723 = vmatprep.subr.bf16.mxu0 %v3926_v57  ;;  %v372_v16 = vld [vmem:[%s4792_s2 + $0x138] sm:$0xff]  ;;  %v369_v19 = vld [vmem:[%s4792_s2 + $0x120] sm:$0xff]  ;;  %v371_v22 = vld [vmem:[%s4792_s2 + $0x130] sm:$0xff] }
  0x15   :  { %2548 = vmatmul.mubr.msk.f32.gmra.mrb[4].mxu0 %vm82_vm0, %v38_v63  ;;  %2755 = vmatprep.subr.bf16.mxu1 %v3936_v60  ;;  %v4022_v23 = vpack.c.bf16 %v372_v16, %v368_v15  ;;  %v374_v24 = vld [vmem:[%s4792_s2 + $0x148] sm:$0xff]  ;;  %v40_v26 = vld [vmem:[%s4790_s0 + $0x20] sm:$0xff]  ;;  %v4035_v27 = vpack.c.bf16 %v369_v19, %v365_v18  ;;  %v376_v28 = vld [vmem:[%s4792_s2 + $0x158] sm:$0xff]  ;;  %v4045_v32 = vpack.c.bf16 %v371_v22, %v367_v21 }
  0x16   :  { %2556 = vmatmul.mubr.msk.f32.gmra.mrb[4].mxu1 %vm82_vm0, %v38_v63  ;;  %2725 = vmatpush1.bf16.msra.mxu0 %v3949_v0  ;;  %v378_v25 = vld [vmem:[%s4792_s2 + $0x168] sm:$0xff]  ;;  %v380_v31 = vld [vmem:[%s4792_s2 + $0x178] sm:$0xff]  ;;  %v373_v33 = vld [vmem:[%s4792_s2 + $0x140] sm:$0xff] }
  0x17   :  { %2757 = vmatpush1.bf16.msra.mxu1 %v3959_v3  ;;  %189 = vmatprep.mubr.f32.mxu0 %v3720_v7  ;;  %v377_v34 = vld [vmem:[%s4792_s2 + $0x160] sm:$0xff]  ;;  %v4055_v36 = vpack.c.bf16 %v378_v25, %v374_v24  ;;  %v375_v37 = vld [vmem:[%s4792_s2 + $0x150] sm:$0xff]  ;;  %v4065_v40 = vpack.c.bf16 %v380_v31, %v376_v28  ;;  %v382_v41 = vld [vmem:[%s4792_s2 + $0x188] sm:$0xff] }
  0x18   :  { %302 = vmatprep.mubr.f32.mxu1 %v3720_v7  ;;  %2727 = vmatprep.subr.bf16.mxu0 %v3969_v6  ;;  %v379_v39 = vld [vmem:[%s4792_s2 + $0x170] sm:$0xff]  ;;  %v386_v43 = vld [vmem:[%s4792_s2 + $0x1a8] sm:$0xff]  ;;  %v4078_v45 = vpack.c.bf16 %v377_v34, %v373_v33  ;;  %v384_v46 = vld [vmem:[%s4792_s2 + $0x198] sm:$0xff] }
  0x19   :  { %2549 = vmatmul.mubr.msk.f32.gmra.mrb[6].mxu0 %vm82_vm0, %v39_v13  ;;  %2759 = vmatprep.subr.bf16.mxu1 %v3979_v10  ;;  %v41_v44 = vld [vmem:[%s4790_s0 + $0x28] sm:$0xff]  ;;  %v388_v48 = vld [vmem:[%s4792_s2 + $0x1b8] sm:$0xff]  ;;  %v4088_v49 = vpack.c.bf16 %v379_v39, %v375_v37  ;;  %v381_v51 = vld [vmem:[%s4792_s2 + $0x180] sm:$0xff] }
  0x1a   :  { %2557 = vmatmul.mubr.msk.f32.gmra.mrb[6].mxu1 %vm82_vm0, %v39_v13  ;;  %2729 = vmatpush1.bf16.msra.mxu0 %v3992_v14  ;;  %v385_v52 = vld [vmem:[%s4792_s2 + $0x1a0] sm:$0xff] }
  0x1b   :  { %2761 = vmatpush1.bf16.msra.mxu1 %v4002_v17  ;;  %195 = vmatprep.mubr.f32.mxu0 %v3720_v7 }
  0x1c   :  { %308 = vmatprep.mubr.f32.mxu1 %v3720_v7  ;;  %2731 = vmatprep.subr.bf16.mxu0 %v4012_v20 }
  0x1d   :  { %2550 = vmatmul.mubr.msk.f32.gmra.mrb[8].mxu0 %vm82_vm0, %v40_v26  ;;  %2763 = vmatprep.subr.bf16.mxu1 %v4022_v23 }
  0x1e   :  { %2558 = vmatmul.mubr.msk.f32.gmra.mrb[8].mxu1 %vm82_vm0, %v40_v26  ;;  %2733 = vmatpush1.bf16.msra.mxu0 %v4035_v27 }
  0x1f   :  { %2765 = vmatpush1.bf16.msra.mxu1 %v4045_v32  ;;  %201 = vmatprep.mubr.f32.mxu0 %v3720_v7 }
  0x20   :  { %15 = vsyncpa [#allocation3], 0  ;;  %314 = vmatprep.mubr.f32.mxu1 %v3720_v7  ;;  %2735 = vmatprep.subr.bf16.mxu0 %v4055_v36  ;;  %v4098_v53 = vpack.c.bf16 %v386_v43, %v382_v41  ;;  %v383_v55 = vld [vmem:[%s4792_s2 + $0x190] sm:$0xff]  ;;  %v4108_v58 = vpack.c.bf16 %v388_v48, %v384_v46  ;;  %v390_v59 = vld [vmem:[%s4792_s2 + $0x1c8] sm:$0xff]  ;;  %v4121_v63 = vpack.c.bf16 %v385_v52, %v381_v51  ;;  %v62_v19 = vlaneseq  ;;  %s3723_s12 = smov [#allocation2]  }
  0x21   :  { %v387_v56 = vld [vmem:[%s4792_s2 + $0x1b0] sm:$0xff]  ;;  %2551 = vmatmul.mubr.msk.f32.gmra.mrb[10].mxu0 %vm82_vm0, %v41_v44  ;;  %2767 = vmatprep.subr.bf16.mxu1 %v4065_v40  ;;  %v394_v61 = vld [vmem:[%s4792_s2 + $0x1e8] sm:$0xff]  ;;  %v392_v1 = vld [vmem:[%s4792_s2 + $0x1d8] sm:$0xff]  ;;  %vm3722_vm6 = vmmov 0   ;;  %vm2371_vm8 = vcmask 523264   ;;  %s2538_s1 = sshll.u32 %s3723_s12, 4  ;;  %s2539_s1 = int_to_ptr.vmem [resolvable:$true] %s2538_s1 }
  0x22   :  { %2559 = vmatmul.mubr.msk.f32.gmra.mrb[10].mxu1 %vm82_vm0, %v41_v44  ;;  %2737 = vmatpush1.bf16.msra.mxu0 %v4078_v45  ;;  %v42_v62 = vld [vmem:[%s4790_s0 + $0x30] sm:$0xff]  ;;  %v396_v2 = vld [vmem:[%s4792_s2 + $0x1f8] sm:$0xff]  ;;  %v4131_v4 = vpack.c.bf16 %v387_v56, %v383_v55  ;;  %v389_v5 = vld [vmem:[%s4792_s2 + $0x1c0] sm:$0xff]  ;;  %v4141_v9 = vpack.c.bf16 %v394_v61, %v390_v59  ;;  %v63_v21 = vshrl.u32 %v62_v19, 7  ;;  %vm2530_vm9 = vcmask 39936   ;;  %p3701_p1 = scmp.lt.s32.totalorder %s2539_s1, %s2539_s1 }
  0x23   :  { %2769 = vmatpush1.bf16.msra.mxu1 %v4088_v49  ;;  %207 = vmatprep.mubr.f32.mxu0 %v3720_v7  ;;  %v393_v8 = vld [vmem:[%s4792_s2 + $0x1e0] sm:$0xff]  ;;  %v391_v11 = vld [vmem:[%s4792_s2 + $0x1d0] sm:$0xff]  ;;  %v4151_v13 = vpack.c.bf16 %v396_v2, %v392_v1  ;;  %v43_v15 = vld [vmem:[%s4790_s0 + $0x38] sm:$0xff] }
  0x24   :  { %320 = vmatprep.mubr.f32.mxu1 %v3720_v7  ;;  %2739 = vmatprep.subr.bf16.mxu0 %v4098_v53  ;;  %v395_v12 = vld [vmem:[%s4792_s2 + $0x1f0] sm:$0xff]  ;;  %v4158_v16 = vpack.c.bf16 %v393_v8, %v389_v5  ;;  %v64_v22 = vsub.s32 0, %v63_v21  ;;  %v60_v24 = vld [vmem:[%s4793_s3] sm:$0xf]  ;;  %v68_v26 = vsub.s32 1, %v63_v21  ;;  %v72_v39 = vsub.s32 2, %v63_v21 }
  0x25   :  { %2552 = vmatmul.mubr.msk.f32.gmra.mrb[12].mxu0 %vm82_vm0, %v42_v62  ;;  %2771 = vmatprep.subr.bf16.mxu1 %v4108_v58  ;;  %v4162_v18 = vpack.c.bf16 %v395_v12, %v391_v11  ;;  %v76_v59 = vsub.s32 3, %v63_v21 }
  0x26   :  { %2560 = vmatmul.mubr.msk.f32.gmra.mrb[12].mxu1 %vm82_vm0, %v42_v62  ;;  %2741 = vmatpush1.bf16.msra.mxu0 %v4121_v63  ;;  %v4222_v34 = vrot.slane %v60_v24, %v64_v22  ;;  %v4224_v37 = vrot.slane %v60_v24, %v68_v26  ;;  %v4228_v55 = vrot.slane %v60_v24, %v72_v39  ;;  %v4234_v26 = vand.u32 127, %v62_v19 }
  0x27   :  { %2773 = vmatpush1.bf16.msra.mxu1 %v4131_v4  ;;  %213 = vmatprep.mubr.f32.mxu0 %v3720_v7  ;;  %v4231_v62 = vrot.slane %v60_v24, %v76_v59 }
  0x28   :  { %326 = vmatprep.mubr.f32.mxu1 %v3720_v7  ;;  %2743 = vmatprep.subr.bf16.mxu0 %v4141_v9  ;;  %vm566_vm1 = vcmp.lt.s32.totalorder %v4234_v26, 32  ;;  %vm738_vm2 = vcmp.lt.s32.totalorder %v4234_v26, 64  ;;  %vm910_vm3 = vcmp.lt.s32.totalorder %v4234_v26, 96  ;;  %vm1912_vm4 = vcmp.ge.s32.totalorder %v4234_v26, 32 }
  0x29   :  { %2553 = vmatmul.mubr.msk.f32.gmra.mrb[14].mxu0 %vm82_vm0, %v43_v15  ;;  %2775 = vmatprep.subr.bf16.mxu1 %v4151_v13  ;;  %vm2085_vm5 = vcmp.ge.s32.totalorder %v4234_v26, 64  ;;  %vm2257_vm7 = vcmp.ge.s32.totalorder %v4234_v26, 96  ;;  %v2597_v26 = vld [vmem:[%s4795_s5] ss:$0 sm:$0xff] }
  0x2a   :  { %2561 = vmatmul.mubr.msk.f32.gmra.mrb[14].mxu1 %vm82_vm0, %v43_v15  ;;  %2745 = vmatpush1.bf16.msra.mxu0 %v4158_v16 }
  0x2b   :  { %2777 = vmatpush1.bf16.msra.mxu1 %v4162_v18  ;;  %463 = vmatprep.mubr.f32.mxu0 %v3720_v7 }
  0x2c   :  { %534 = vmatprep.mubr.f32.mxu1 %v3720_v7  ;;  %2779 = vmatprep.subr.bf16.mxu0 %v3841_v29 }
  0x2d   :  { %464 = vmatmul.mubr.f32.vlgmr.msra.gmra.mrb[0].mxu0 %v3720_v7  ;;  %2811 = vmatprep.subr.bf16.mxu1 %v3843_v30 }
  0x2e   :  { %535 = vmatmul.mubr.f32.vlgmr.msra.gmra.mrb[0].mxu1 %v3720_v7  ;;  %2781 = vmatpush1.bf16.msra.mxu0 %v3857_v35 }
  0x2f   :  { %2813 = vmatpush1.bf16.msra.mxu1 %v3866_v38  ;;  %2783 = vmatprep.subr.bf16.mxu0 %v3878_v42 }
  0x30   :  { %2815 = vmatprep.subr.bf16.mxu1 %v3893_v47  ;;  %636 = vmatprep.mubr.f32.mxu0 %v3720_v7 }
  0x31   :  { %707 = vmatprep.mubr.f32.mxu1 %v3720_v7 }
  0x32   :  { %2785 = vmatpush1.bf16.msra.mxu0 %v3903_v50 }
  0x33   :  { %2817 = vmatpush1.bf16.msra.mxu1 %v3916_v54  ;;  %2787 = vmatprep.subr.bf16.mxu0 %v3926_v57 }
  0x34   :  { %2819 = vmatprep.subr.bf16.mxu1 %v3936_v60 }
  0x36   :  { %2789 = vmatpush1.bf16.msra.mxu0 %v3949_v0 }
  0x37   :  { %2821 = vmatpush1.bf16.msra.mxu1 %v3959_v3  ;;  %2791 = vmatprep.subr.bf16.mxu0 %v3969_v6 }
  0x38   :  { %2823 = vmatprep.subr.bf16.mxu1 %v3979_v10 }
  0x3a   :  { %2793 = vmatpush1.bf16.msra.mxu0 %v3992_v14 }
  0x3b   :  { %2825 = vmatpush1.bf16.msra.mxu1 %v4002_v17  ;;  %2795 = vmatprep.subr.bf16.mxu0 %v4012_v20 }
  0x3c   :  { %2827 = vmatprep.subr.bf16.mxu1 %v4022_v23 }
  0x3e   :  { %2797 = vmatpush1.bf16.msra.mxu0 %v4035_v27 }
  0x3f   :  { %2829 = vmatpush1.bf16.msra.mxu1 %v4045_v32  ;;  %2799 = vmatprep.subr.bf16.mxu0 %v4055_v36 }
  0x40   :  { %2831 = vmatprep.subr.bf16.mxu1 %v4065_v40 }
  0x42   :  { %2801 = vmatpush1.bf16.msra.mxu0 %v4078_v45 }
  0x43   :  { %2833 = vmatpush1.bf16.msra.mxu1 %v4088_v49  ;;  %2803 = vmatprep.subr.bf16.mxu0 %v4098_v53 }
  0x44   :  { %2835 = vmatprep.subr.bf16.mxu1 %v4108_v58 }
  0x46   :  { %2805 = vmatpush1.bf16.msra.mxu0 %v4121_v63 }
  0x47   :  { %2837 = vmatpush1.bf16.msra.mxu1 %v4131_v4  ;;  %2807 = vmatprep.subr.bf16.mxu0 %v4141_v9 }
  0x48   :  { %2839 = vmatprep.subr.bf16.mxu1 %v4151_v13 }
  0x4a   :  { %2809 = vmatpush1.bf16.msra.mxu0 %v4158_v16 }
  0x4b   :  { %2841 = vmatpush1.bf16.msra.mxu1 %v4162_v18  ;;  %2843 = vmatprep.subr.bf16.mxu0 %v3841_v29 }
  0x4c   :  { %2875 = vmatprep.subr.bf16.mxu1 %v3843_v30 }
  0xfc   :  { %v4214_v25 = vpop.f32.mrb[14].mxu0 }
  0xfd   :  { %v4216_v28 = vpop.f32.mrb[15].mxu0  ;;  %v4218_v31 = vpop.f32.mrb[14].mxu1 }
  0xfe   :  { %v4220_v33 = vpop.f32.mrb[15].mxu1 }
 0x100   :  { %v465_v41 = vpop.f32.mrb[0].mxu0 }
 0x101   :  { %v3460_v43 = vadd.f32 %v465_v41, %v4222_v34  ;;  %v536_v44 = vpop.f32.mrb[0].mxu1  ;;  %v467_v46 = vpop.f32.mrb[1].mxu0 }
 0x102   :  { %v3461_v48 = vadd.f32 %v467_v46, %v4224_v37  ;;  %v538_v51 = vpop.f32.mrb[1].mxu1  ;;  %v3474_v61 = vadd.f32 %v536_v44, %v4228_v55 }
 0x103   :  { %v2562_v52 = vmul.f32 -1.442695, %v3460_v43  ;;  %v3475_v2 = vadd.f32 %v538_v51, %v4231_v62 }
 0x104   :  { %v2563_v56 = vmul.f32 -1.442695, %v3461_v48  ;;  %v2564_v1 = vmul.f32 -1.442695, %v3474_v61 }
 0x105   :  { %3520 = vpow2.f32 %v2562_v52 }
 0x106   :  { %3522 = vpow2.f32 %v2563_v56 }
 0x107   :  { %3524 = vpow2.f32 %v2564_v1 }
 0x108   :  { %3526 = vtanh.f32 %v3475_v2 }
 0x10f   :  { %v3521_v5 = vpop.eup %3520 }
 0x110   :  { %v550_v8 = vadd.f32 1.0, %v3521_v5  ;;  %v3523_v11 = vpop.eup %3522 }
 0x111   :  { %v551_v12 = vadd.f32 1.0, %v3523_v11  ;;  %v3525_v15 = vpop.eup %3524 }
 0x112   :  { %3528 = vrcp.f32 %v550_v8  ;;  %v3527_v22 = vpop.eup %3526  ;;  %v552_v24 = vadd.f32 1.0, %v3525_v15 }
 0x113   :  { %3530 = vrcp.f32 %v551_v12 }
 0x114   :  { %3532 = vrcp.f32 %v552_v24 }
 0x11c   :  { %v3529_v21 = vpop.eup %3528 }
 0x11d   :  { %v561_v39 = vmul.f32 %v3529_v21, %v3527_v22  ;;  %v3531_v41 = vpop.eup %3530 }
 0x11e   :  { %v560_v43 = vmul.f32 0.0, %v3531_v41  ;;  %v3533_v48 = vpop.eup %3532 }
 0x120   :  { %v562_v44 = vadd.f32 %v561_v39, %v560_v43 }
 0x122   :  { %3534 = vtanh.f32 %v562_v44  ;;  %v4237_v46 = vsel %vm566_vm1, %v562_v44, 0.0 }
 0x12c   :  { %v3535_v51 = vpop.eup %3534 }
 0x12d   :  { %v564_v52 = vmul.f32 %v3535_v51, %v3533_v48 }
 0x12f   :  { %2565 = vmatmul.mubr.msk.f32.vlgmr.msra.gmra.mrb[2].mxu0 %vm566_vm1, %v564_v52  ;;  %2566 = vmatmul.mubr.msk.f32.vlgmr.msra.gmra.mrb[2].mxu1 %vm566_vm1, %v564_v52  ;;  %v4239_v56 = vsel %vm566_vm1, %v564_v52, 0.0 }
 0x130   :  { %2845 = vmatpush1.bf16.msra.mxu0 %v3857_v35  ;;  %2877 = vmatpush1.bf16.msra.mxu1 %v3866_v38 }
 0x131   :  { %2847 = vmatprep.subr.bf16.mxu0 %v3878_v42  ;;  %2879 = vmatprep.subr.bf16.mxu1 %v3893_v47 }
 0x132   :  { %808 = vmatprep.mubr.f32.mxu0 %v3720_v7  ;;  %879 = vmatprep.mubr.f32.mxu1 %v3720_v7 }
 0x134   :  { %2849 = vmatpush1.bf16.msra.mxu0 %v3903_v50  ;;  %2881 = vmatpush1.bf16.msra.mxu1 %v3916_v54 }
 0x135   :  { %2851 = vmatprep.subr.bf16.mxu0 %v3926_v57  ;;  %2883 = vmatprep.subr.bf16.mxu1 %v3936_v60 }
 0x138   :  { %2853 = vmatpush1.bf16.msra.mxu0 %v3949_v0  ;;  %2885 = vmatpush1.bf16.msra.mxu1 %v3959_v3 }
 0x139   :  { %2855 = vmatprep.subr.bf16.mxu0 %v3969_v6  ;;  %2887 = vmatprep.subr.bf16.mxu1 %v3979_v10 }
 0x13c   :  { %2857 = vmatpush1.bf16.msra.mxu0 %v3992_v14  ;;  %2889 = vmatpush1.bf16.msra.mxu1 %v4002_v17 }
 0x13d   :  { %2859 = vmatprep.subr.bf16.mxu0 %v4012_v20  ;;  %2891 = vmatprep.subr.bf16.mxu1 %v4022_v23 }
 0x140   :  { %2861 = vmatpush1.bf16.msra.mxu0 %v4035_v27  ;;  %2893 = vmatpush1.bf16.msra.mxu1 %v4045_v32 }
 0x141   :  { %2863 = vmatprep.subr.bf16.mxu0 %v4055_v36  ;;  %2895 = vmatprep.subr.bf16.mxu1 %v4065_v40 }
 0x144   :  { %2865 = vmatpush1.bf16.msra.mxu0 %v4078_v45  ;;  %2897 = vmatpush1.bf16.msra.mxu1 %v4088_v49 }
 0x145   :  { %2867 = vmatprep.subr.bf16.mxu0 %v4098_v53  ;;  %2899 = vmatprep.subr.bf16.mxu1 %v4108_v58 }
 0x148   :  { %2869 = vmatpush1.bf16.msra.mxu0 %v4121_v63  ;;  %2901 = vmatpush1.bf16.msra.mxu1 %v4131_v4 }
 0x149   :  { %2871 = vmatprep.subr.bf16.mxu0 %v4141_v9  ;;  %2903 = vmatprep.subr.bf16.mxu1 %v4151_v13 }
 0x14c   :  { %2873 = vmatpush1.bf16.msra.mxu0 %v4158_v16  ;;  %2905 = vmatpush1.bf16.msra.mxu1 %v4162_v18 }
 0x14d   :  { %2907 = vmatprep.subr.bf16.mxu0 %v3841_v29  ;;  %2939 = vmatprep.subr.bf16.mxu1 %v3843_v30 }
 0x202   :  { %v638_v19 = vpop.f32.mrb[2].mxu0  ;;  %v709_v59 = vpop.f32.mrb[2].mxu1 }
 0x203   :  { %v3462_v61 = vadd.f32 %v638_v19, %v4222_v34  ;;  %v640_v1 = vpop.f32.mrb[3].mxu0  ;;  %v711_v2 = vpop.f32.mrb[3].mxu1  ;;  %v3476_v12 = vadd.f32 %v709_v59, %v4228_v55 }
 0x204   :  { %v3463_v5 = vadd.f32 %v640_v1, %v4224_v37  ;;  %v3477_v15 = vadd.f32 %v711_v2, %v4231_v62 }
 0x205   :  { %v2567_v8 = vmul.f32 -1.442695, %v3462_v61  ;;  %v2569_v22 = vmul.f32 -1.442695, %v3476_v12 }
 0x206   :  { %v2568_v11 = vmul.f32 -1.442695, %v3463_v5 }
 0x207   :  { %3536 = vpow2.f32 %v2567_v8 }
 0x208   :  { %3538 = vpow2.f32 %v2568_v11 }
 0x209   :  { %3540 = vtanh.f32 %v3477_v15 }
 0x20a   :  { %3542 = vpow2.f32 %v2569_v22 }
 0x211   :  { %v3537_v21 = vpop.eup %3536 }
 0x212   :  { %v723_v39 = vadd.f32 1.0, %v3537_v21  ;;  %v3539_v41 = vpop.eup %3538 }
 0x213   :  { %v724_v24 = vadd.f32 1.0, %v3539_v41  ;;  %v3541_v43 = vpop.eup %3540 }
 0x214   :  { %3544 = vrcp.f32 %v723_v39  ;;  %v3543_v44 = vpop.eup %3542 }
 0x215   :  { %3546 = vrcp.f32 %v724_v24  ;;  %v725_v19 = vadd.f32 1.0, %v3543_v44 }
 0x217   :  { %3548 = vrcp.f32 %v725_v19 }
 0x21e   :  { %v3545_v48 = vpop.eup %3544 }
 0x21f   :  { %v734_v51 = vmul.f32 %v3545_v48, %v3541_v43  ;;  %v3547_v52 = vpop.eup %3546 }
 0x220   :  { %v733_v61 = vmul.f32 %v3547_v52, %v4237_v46 }
 0x221   :  { %v3549_v2 = vpop.eup %3548 }
 0x222   :  { %v735_v59 = vadd.f32 %v734_v51, %v733_v61 }
 0x224   :  { %3550 = vtanh.f32 %v735_v59  ;;  %v4282_v1 = vsel %vm738_vm2, %v735_v59, %v4237_v46 }
 0x22e   :  { %v3551_v5 = vpop.eup %3550 }
 0x22f   :  { %v737_v8 = vmul.f32 %v3551_v5, %v3549_v2 }
 0x231   :  { %v4285_v11 = vsel %vm738_vm2, %v737_v8, %v4239_v56 }
 0x232   :  { %809 = vmatmul.mubr.f32.vlgmr.msra.gmra.mrb[4].mxu0 %v4285_v11  ;;  %880 = vmatmul.mubr.f32.vlgmr.msra.gmra.mrb[4].mxu1 %v4285_v11 }
 0x233   :  { %2909 = vmatpush1.bf16.msra.mxu0 %v3857_v35  ;;  %2941 = vmatpush1.bf16.msra.mxu1 %v3866_v38 }
 0x234   :  { %2911 = vmatprep.subr.bf16.mxu0 %v3878_v42  ;;  %2943 = vmatprep.subr.bf16.mxu1 %v3893_v47 }
 0x235   :  { %980 = vmatprep.mubr.f32.mxu0 %v3720_v7  ;;  %1051 = vmatprep.mubr.f32.mxu1 %v3720_v7 }
 0x237   :  { %2913 = vmatpush1.bf16.msra.mxu0 %v3903_v50  ;;  %2945 = vmatpush1.bf16.msra.mxu1 %v3916_v54 }
 0x238   :  { %2915 = vmatprep.subr.bf16.mxu0 %v3926_v57  ;;  %2947 = vmatprep.subr.bf16.mxu1 %v3936_v60 }
 0x23b   :  { %2917 = vmatpush1.bf16.msra.mxu0 %v3949_v0  ;;  %2949 = vmatpush1.bf16.msra.mxu1 %v3959_v3 }
 0x23c   :  { %2919 = vmatprep.subr.bf16.mxu0 %v3969_v6  ;;  %2951 = vmatprep.subr.bf16.mxu1 %v3979_v10 }
 0x23f   :  { %2921 = vmatpush1.bf16.msra.mxu0 %v3992_v14  ;;  %2953 = vmatpush1.bf16.msra.mxu1 %v4002_v17 }
 0x240   :  { %2923 = vmatprep.subr.bf16.mxu0 %v4012_v20  ;;  %2955 = vmatprep.subr.bf16.mxu1 %v4022_v23 }
 0x243   :  { %2925 = vmatpush1.bf16.msra.mxu0 %v4035_v27  ;;  %2957 = vmatpush1.bf16.msra.mxu1 %v4045_v32 }
 0x244   :  { %2927 = vmatprep.subr.bf16.mxu0 %v4055_v36  ;;  %2959 = vmatprep.subr.bf16.mxu1 %v4065_v40 }
 0x247   :  { %2929 = vmatpush1.bf16.msra.mxu0 %v4078_v45  ;;  %2961 = vmatpush1.bf16.msra.mxu1 %v4088_v49 }
 0x248   :  { %2931 = vmatprep.subr.bf16.mxu0 %v4098_v53  ;;  %2963 = vmatprep.subr.bf16.mxu1 %v4108_v58 }
 0x24b   :  { %2933 = vmatpush1.bf16.msra.mxu0 %v4121_v63  ;;  %2965 = vmatpush1.bf16.msra.mxu1 %v4131_v4 }
 0x24c   :  { %2935 = vmatprep.subr.bf16.mxu0 %v4141_v9  ;;  %2967 = vmatprep.subr.bf16.mxu1 %v4151_v13 }
 0x24f   :  { %2937 = vmatpush1.bf16.msra.mxu0 %v4158_v16  ;;  %2969 = vmatpush1.bf16.msra.mxu1 %v4162_v18 }
 0x250   :  { %2971 = vmatprep.subr.bf16.mxu0 %v3841_v29  ;;  %3003 = vmatprep.subr.bf16.mxu1 %v3843_v30 }
 0x305   :  { %v810_v46 = vpop.f32.mrb[4].mxu0  ;;  %v881_v56 = vpop.f32.mrb[4].mxu1 }
 0x306   :  { %v3464_v12 = vadd.f32 %v810_v46, %v4222_v34  ;;  %v812_v15 = vpop.f32.mrb[5].mxu0  ;;  %v883_v22 = vpop.f32.mrb[5].mxu1  ;;  %v3478_v24 = vadd.f32 %v881_v56, %v4228_v55 }
 0x307   :  { %v3465_v21 = vadd.f32 %v812_v15, %v4224_v37  ;;  %v3479_v43 = vadd.f32 %v883_v22, %v4231_v62 }
 0x308   :  { %v2570_v39 = vmul.f32 -1.442695, %v3464_v12  ;;  %v2572_v44 = vmul.f32 -1.442695, %v3478_v24 }
 0x309   :  { %v2571_v41 = vmul.f32 -1.442695, %v3465_v21 }
 0x30a   :  { %3552 = vpow2.f32 %v2570_v39 }
 0x30b   :  { %3554 = vpow2.f32 %v2571_v41 }
 0x30c   :  { %3556 = vtanh.f32 %v3479_v43 }
 0x30d   :  { %3558 = vpow2.f32 %v2572_v44 }
 0x314   :  { %v3553_v48 = vpop.eup %3552 }
 0x315   :  { %v895_v51 = vadd.f32 1.0, %v3553_v48  ;;  %v3555_v52 = vpop.eup %3554 }
 0x316   :  { %v896_v19 = vadd.f32 1.0, %v3555_v52  ;;  %v3557_v61 = vpop.eup %3556 }
 0x317   :  { %3560 = vrcp.f32 %v895_v51  ;;  %v3559_v59 = vpop.eup %3558 }
 0x318   :  { %3562 = vrcp.f32 %v896_v19  ;;  %v897_v46 = vadd.f32 1.0, %v3559_v59 }
 0x31a   :  { %3564 = vrcp.f32 %v897_v46 }
 0x321   :  { %v3561_v2 = vpop.eup %3560 }
 0x322   :  { %v906_v5 = vmul.f32 %v3561_v2, %v3557_v61  ;;  %v3563_v8 = vpop.eup %3562 }
 0x323   :  { %v905_v12 = vmul.f32 %v3563_v8, %v4282_v1 }
 0x324   :  { %v3565_v22 = vpop.eup %3564 }
 0x325   :  { %v907_v56 = vadd.f32 %v906_v5, %v905_v12 }
 0x327   :  { %3566 = vtanh.f32 %v907_v56  ;;  %v4330_v15 = vsel %vm910_vm3, %v907_v56, %v4282_v1 }
 0x331   :  { %v3567_v21 = vpop.eup %3566 }
 0x332   :  { %v909_v39 = vmul.f32 %v3567_v21, %v3565_v22 }
 0x334   :  { %v915_v41 = vsel %vm910_vm3, %v909_v39, %v4285_v11 }
 0x335   :  { %981 = vmatmul.mubr.f32.vlgmr.msra.gmra.mrb[6].mxu0 %v915_v41  ;;  %1052 = vmatmul.mubr.f32.vlgmr.msra.gmra.mrb[6].mxu1 %v915_v41 }
 0x336   :  { %2973 = vmatpush1.bf16.msra.mxu0 %v3857_v35  ;;  %3005 = vmatpush1.bf16.msra.mxu1 %v3866_v38 }
 0x337   :  { %2975 = vmatprep.subr.bf16.mxu0 %v3878_v42  ;;  %3007 = vmatprep.subr.bf16.mxu1 %v3893_v47 }
 0x338   :  { %1146 = vmatprep.mubr.f32.mxu0 %v3720_v7  ;;  %1217 = vmatprep.mubr.f32.mxu1 %v3720_v7 }
 0x33a   :  { %2977 = vmatpush1.bf16.msra.mxu0 %v3903_v50  ;;  %3009 = vmatpush1.bf16.msra.mxu1 %v3916_v54 }
 0x33b   :  { %2979 = vmatprep.subr.bf16.mxu0 %v3926_v57  ;;  %3011 = vmatprep.subr.bf16.mxu1 %v3936_v60 }
 0x33e   :  { %2981 = vmatpush1.bf16.msra.mxu0 %v3949_v0  ;;  %3013 = vmatpush1.bf16.msra.mxu1 %v3959_v3 }
 0x33f   :  { %2983 = vmatprep.subr.bf16.mxu0 %v3969_v6  ;;  %3015 = vmatprep.subr.bf16.mxu1 %v3979_v10 }
 0x342   :  { %2985 = vmatpush1.bf16.msra.mxu0 %v3992_v14  ;;  %3017 = vmatpush1.bf16.msra.mxu1 %v4002_v17 }
 0x343   :  { %2987 = vmatprep.subr.bf16.mxu0 %v4012_v20  ;;  %3019 = vmatprep.subr.bf16.mxu1 %v4022_v23 }
 0x346   :  { %2989 = vmatpush1.bf16.msra.mxu0 %v4035_v27  ;;  %3021 = vmatpush1.bf16.msra.mxu1 %v4045_v32 }
 0x347   :  { %2991 = vmatprep.subr.bf16.mxu0 %v4055_v36  ;;  %3023 = vmatprep.subr.bf16.mxu1 %v4065_v40 }
 0x34a   :  { %2993 = vmatpush1.bf16.msra.mxu0 %v4078_v45  ;;  %3025 = vmatpush1.bf16.msra.mxu1 %v4088_v49 }
 0x34b   :  { %2995 = vmatprep.subr.bf16.mxu0 %v4098_v53  ;;  %3027 = vmatprep.subr.bf16.mxu1 %v4108_v58 }
 0x34e   :  { %2997 = vmatpush1.bf16.msra.mxu0 %v4121_v63  ;;  %3029 = vmatpush1.bf16.msra.mxu1 %v4131_v4 }
 0x34f   :  { %2999 = vmatprep.subr.bf16.mxu0 %v4141_v9  ;;  %3031 = vmatprep.subr.bf16.mxu1 %v4151_v13 }
 0x352   :  { %3001 = vmatpush1.bf16.msra.mxu0 %v4158_v16  ;;  %3033 = vmatpush1.bf16.msra.mxu1 %v4162_v18 }
 0x353   :  { %3035 = vmatprep.subr.bf16.mxu0 %v3841_v29  ;;  %3067 = vmatprep.subr.bf16.mxu1 %v3843_v30 }
 0x408   :  { %v982_v1 = vpop.f32.mrb[6].mxu0  ;;  %v1053_v11 = vpop.f32.mrb[6].mxu1 }
 0x409   :  { %v3466_v24 = vadd.f32 %v982_v1, %v4222_v34  ;;  %v984_v43 = vpop.f32.mrb[7].mxu0  ;;  %v1055_v44 = vpop.f32.mrb[7].mxu1  ;;  %v3480_v19 = vadd.f32 %v1053_v11, %v4228_v55 }
 0x40a   :  { %v3467_v48 = vadd.f32 %v984_v43, %v4224_v37  ;;  %v3481_v61 = vadd.f32 %v1055_v44, %v4231_v62 }
 0x40b   :  { %v2573_v51 = vmul.f32 -1.442695, %v3466_v24  ;;  %v2575_v59 = vmul.f32 -1.442695, %v3480_v19 }
 0x40c   :  { %v2574_v52 = vmul.f32 -1.442695, %v3467_v48 }
 0x40d   :  { %3568 = vpow2.f32 %v2573_v51 }
 0x40e   :  { %3570 = vpow2.f32 %v2574_v52 }
 0x40f   :  { %3572 = vtanh.f32 %v3481_v61 }
 0x410   :  { %3574 = vpow2.f32 %v2575_v59 }
 0x417   :  { %v3569_v2 = vpop.eup %3568 }
 0x418   :  { %v1067_v5 = vadd.f32 1.0, %v3569_v2  ;;  %v3571_v8 = vpop.eup %3570 }
 0x419   :  { %v1068_v46 = vadd.f32 1.0, %v3571_v8  ;;  %v3573_v12 = vpop.eup %3572 }
 0x41a   :  { %3576 = vrcp.f32 %v1067_v5  ;;  %v3575_v56 = vpop.eup %3574 }
 0x41b   :  { %3578 = vrcp.f32 %v1068_v46  ;;  %v1069_v41 = vadd.f32 1.0, %v3575_v56 }
 0x41d   :  { %3580 = vrcp.f32 %v1069_v41 }
 0x424   :  { %v3577_v22 = vpop.eup %3576 }
 0x425   :  { %v1078_v21 = vmul.f32 %v3577_v22, %v3573_v12  ;;  %v3579_v39 = vpop.eup %3578 }
 0x426   :  { %v1077_v1 = vmul.f32 %v3579_v39, %v4330_v15 }
 0x427   :  { %v3581_v24 = vpop.eup %3580 }
 0x428   :  { %v4372_v11 = vadd.f32 %v1078_v21, %v1077_v1 }
 0x42a   :  { %3582 = vtanh.f32 %v4372_v11 }
 0x434   :  { %v3583_v43 = vpop.eup %3582 }
 0x435   :  { %v1081_v44 = vmul.f32 %v3583_v43, %v3581_v24 }
 0x437   :  { %1147 = vmatmul.mubr.f32.vlgmr.msra.gmra.mrb[8].mxu0 %v1081_v44  ;;  %1218 = vmatmul.mubr.f32.vlgmr.msra.gmra.mrb[8].mxu1 %v1081_v44 }
 0x438   :  { %3037 = vmatpush1.bf16.msra.mxu0 %v3857_v35  ;;  %3069 = vmatpush1.bf16.msra.mxu1 %v3866_v38 }
 0x439   :  { %3039 = vmatprep.subr.bf16.mxu0 %v3878_v42  ;;  %3071 = vmatprep.subr.bf16.mxu1 %v3893_v47 }
 0x43a   :  { %1312 = vmatprep.mubr.f32.mxu0 %v3720_v7  ;;  %1383 = vmatprep.mubr.f32.mxu1 %v3720_v7 }
 0x43c   :  { %3041 = vmatpush1.bf16.msra.mxu0 %v3903_v50  ;;  %3073 = vmatpush1.bf16.msra.mxu1 %v3916_v54 }
 0x43d   :  { %3043 = vmatprep.subr.bf16.mxu0 %v3926_v57  ;;  %3075 = vmatprep.subr.bf16.mxu1 %v3936_v60 }
 0x440   :  { %3045 = vmatpush1.bf16.msra.mxu0 %v3949_v0  ;;  %3077 = vmatpush1.bf16.msra.mxu1 %v3959_v3 }
 0x441   :  { %3047 = vmatprep.subr.bf16.mxu0 %v3969_v6  ;;  %3079 = vmatprep.subr.bf16.mxu1 %v3979_v10 }
 0x444   :  { %3049 = vmatpush1.bf16.msra.mxu0 %v3992_v14  ;;  %3081 = vmatpush1.bf16.msra.mxu1 %v4002_v17 }
 0x445   :  { %3051 = vmatprep.subr.bf16.mxu0 %v4012_v20  ;;  %3083 = vmatprep.subr.bf16.mxu1 %v4022_v23 }
 0x448   :  { %3053 = vmatpush1.bf16.msra.mxu0 %v4035_v27  ;;  %3085 = vmatpush1.bf16.msra.mxu1 %v4045_v32 }
 0x449   :  { %3055 = vmatprep.subr.bf16.mxu0 %v4055_v36  ;;  %3087 = vmatprep.subr.bf16.mxu1 %v4065_v40 }
 0x44c   :  { %3057 = vmatpush1.bf16.msra.mxu0 %v4078_v45  ;;  %3089 = vmatpush1.bf16.msra.mxu1 %v4088_v49 }
 0x44d   :  { %3059 = vmatprep.subr.bf16.mxu0 %v4098_v53  ;;  %3091 = vmatprep.subr.bf16.mxu1 %v4108_v58 }
 0x450   :  { %3061 = vmatpush1.bf16.msra.mxu0 %v4121_v63  ;;  %3093 = vmatpush1.bf16.msra.mxu1 %v4131_v4 }
 0x451   :  { %3063 = vmatprep.subr.bf16.mxu0 %v4141_v9  ;;  %3095 = vmatprep.subr.bf16.mxu1 %v4151_v13 }
 0x454   :  { %3065 = vmatpush1.bf16.msra.mxu0 %v4158_v16  ;;  %3097 = vmatpush1.bf16.msra.mxu1 %v4162_v18 }
 0x455   :  { %3099 = vmatprep.subr.bf16.mxu0 %v3841_v29  ;;  %3131 = vmatprep.subr.bf16.mxu1 %v3843_v30 }
 0x50a   :  { %v1148_v15 = vpop.f32.mrb[8].mxu0  ;;  %v1219_v48 = vpop.f32.mrb[8].mxu1 }
 0x50b   :  { %v3468_v51 = vadd.f32 %v1148_v15, %v4222_v34  ;;  %v1150_v52 = vpop.f32.mrb[9].mxu0  ;;  %v1221_v19 = vpop.f32.mrb[9].mxu1  ;;  %v3482_v5 = vadd.f32 %v1219_v48, %v4228_v55 }
 0x50c   :  { %v3469_v61 = vadd.f32 %v1150_v52, %v4224_v37  ;;  %v3483_v8 = vadd.f32 %v1221_v19, %v4231_v62 }
 0x50d   :  { %v2576_v59 = vmul.f32 -1.442695, %v3468_v51  ;;  %v2578_v46 = vmul.f32 -1.442695, %v3482_v5 }
 0x50e   :  { %v2577_v2 = vmul.f32 -1.442695, %v3469_v61 }
 0x50f   :  { %3584 = vpow2.f32 %v2576_v59 }
 0x510   :  { %3586 = vpow2.f32 %v2577_v2 }
 0x511   :  { %3588 = vtanh.f32 %v3483_v8 }
 0x512   :  { %3590 = vpow2.f32 %v2578_v46 }
 0x519   :  { %v3585_v12 = vpop.eup %3584 }
 0x51a   :  { %v1233_v56 = vadd.f32 1.0, %v3585_v12  ;;  %v3587_v22 = vpop.eup %3586 }
 0x51b   :  { %v1234_v21 = vadd.f32 1.0, %v3587_v22  ;;  %v3589_v39 = vpop.eup %3588 }
 0x51c   :  { %3592 = vrcp.f32 %v1233_v56  ;;  %v3591_v41 = vpop.eup %3590 }
 0x51d   :  { %3594 = vrcp.f32 %v1234_v21  ;;  %v1235_v44 = vadd.f32 1.0, %v3591_v41 }
 0x51f   :  { %3596 = vrcp.f32 %v1235_v44 }
 0x526   :  { %v3593_v1 = vpop.eup %3592 }
 0x527   :  { %v1244_v24 = vmul.f32 %v3593_v1, %v3589_v39  ;;  %v3595_v43 = vpop.eup %3594 }
 0x528   :  { %v1243_v15 = vmul.f32 %v3595_v43, %v4372_v11 }
 0x529   :  { %v3597_v51 = vpop.eup %3596 }
 0x52a   :  { %v4414_v48 = vadd.f32 %v1244_v24, %v1243_v15 }
 0x52c   :  { %3598 = vtanh.f32 %v4414_v48 }
 0x536   :  { %v3599_v52 = vpop.eup %3598 }
 0x537   :  { %v1247_v19 = vmul.f32 %v3599_v52, %v3597_v51 }
 0x539   :  { %1313 = vmatmul.mubr.f32.vlgmr.msra.gmra.mrb[10].mxu0 %v1247_v19  ;;  %1384 = vmatmul.mubr.f32.vlgmr.msra.gmra.mrb[10].mxu1 %v1247_v19 }
 0x53a   :  { %3101 = vmatpush1.bf16.msra.mxu0 %v3857_v35  ;;  %3133 = vmatpush1.bf16.msra.mxu1 %v3866_v38 }
 0x53b   :  { %3103 = vmatprep.subr.bf16.mxu0 %v3878_v42  ;;  %3135 = vmatprep.subr.bf16.mxu1 %v3893_v47 }
 0x53c   :  { %1478 = vmatprep.mubr.f32.mxu0 %v3720_v7  ;;  %1549 = vmatprep.mubr.f32.mxu1 %v3720_v7 }
 0x53e   :  { %3105 = vmatpush1.bf16.msra.mxu0 %v3903_v50  ;;  %3137 = vmatpush1.bf16.msra.mxu1 %v3916_v54 }
 0x53f   :  { %3107 = vmatprep.subr.bf16.mxu0 %v3926_v57  ;;  %3139 = vmatprep.subr.bf16.mxu1 %v3936_v60 }
 0x542   :  { %3109 = vmatpush1.bf16.msra.mxu0 %v3949_v0  ;;  %3141 = vmatpush1.bf16.msra.mxu1 %v3959_v3 }
 0x543   :  { %3111 = vmatprep.subr.bf16.mxu0 %v3969_v6  ;;  %3143 = vmatprep.subr.bf16.mxu1 %v3979_v10 }
 0x546   :  { %3113 = vmatpush1.bf16.msra.mxu0 %v3992_v14  ;;  %3145 = vmatpush1.bf16.msra.mxu1 %v4002_v17 }
 0x547   :  { %3115 = vmatprep.subr.bf16.mxu0 %v4012_v20  ;;  %3147 = vmatprep.subr.bf16.mxu1 %v4022_v23 }
 0x54a   :  { %3117 = vmatpush1.bf16.msra.mxu0 %v4035_v27  ;;  %3149 = vmatpush1.bf16.msra.mxu1 %v4045_v32 }
 0x54b   :  { %3119 = vmatprep.subr.bf16.mxu0 %v4055_v36  ;;  %3151 = vmatprep.subr.bf16.mxu1 %v4065_v40 }
 0x54e   :  { %3121 = vmatpush1.bf16.msra.mxu0 %v4078_v45  ;;  %3153 = vmatpush1.bf16.msra.mxu1 %v4088_v49 }
 0x54f   :  { %3123 = vmatprep.subr.bf16.mxu0 %v4098_v53  ;;  %3155 = vmatprep.subr.bf16.mxu1 %v4108_v58 }
 0x552   :  { %3125 = vmatpush1.bf16.msra.mxu0 %v4121_v63  ;;  %3157 = vmatpush1.bf16.msra.mxu1 %v4131_v4 }
 0x553   :  { %3127 = vmatprep.subr.bf16.mxu0 %v4141_v9  ;;  %3159 = vmatprep.subr.bf16.mxu1 %v4151_v13 }
 0x556   :  { %3129 = vmatpush1.bf16.msra.mxu0 %v4158_v16  ;;  %3161 = vmatpush1.bf16.msra.mxu1 %v4162_v18 }
 0x557   :  { %3163 = vmatprep.subr.bf16.mxu0 %v3841_v29  ;;  %3195 = vmatprep.subr.bf16.mxu1 %v3843_v30 }
 0x60c   :  { %v1314_v11 = vpop.f32.mrb[10].mxu0  ;;  %v1385_v61 = vpop.f32.mrb[10].mxu1 }
 0x60d   :  { %v3470_v59 = vadd.f32 %v1314_v11, %v4222_v34  ;;  %v1316_v2 = vpop.f32.mrb[11].mxu0  ;;  %v1387_v5 = vpop.f32.mrb[11].mxu1  ;;  %v3484_v56 = vadd.f32 %v1385_v61, %v4228_v55 }
 0x60e   :  { %v3471_v8 = vadd.f32 %v1316_v2, %v4224_v37  ;;  %v3485_v22 = vadd.f32 %v1387_v5, %v4231_v62 }
 0x60f   :  { %v2579_v46 = vmul.f32 -1.442695, %v3470_v59  ;;  %v2581_v21 = vmul.f32 -1.442695, %v3484_v56 }
 0x610   :  { %v2580_v12 = vmul.f32 -1.442695, %v3471_v8 }
 0x611   :  { %3600 = vpow2.f32 %v2579_v46 }
 0x612   :  { %3602 = vpow2.f32 %v2580_v12 }
 0x613   :  { %3604 = vtanh.f32 %v3485_v22 }
 0x614   :  { %3606 = vpow2.f32 %v2581_v21 }
 0x61b   :  { %v3601_v39 = vpop.eup %3600 }
 0x61c   :  { %v1399_v41 = vadd.f32 1.0, %v3601_v39  ;;  %v3603_v1 = vpop.eup %3602 }
 0x61d   :  { %v1400_v24 = vadd.f32 1.0, %v3603_v1  ;;  %v3605_v43 = vpop.eup %3604 }
 0x61e   :  { %3608 = vrcp.f32 %v1399_v41  ;;  %v3607_v44 = vpop.eup %3606 }
 0x61f   :  { %3610 = vrcp.f32 %v1400_v24  ;;  %v1401_v19 = vadd.f32 1.0, %v3607_v44 }
 0x621   :  { %3612 = vrcp.f32 %v1401_v19 }
 0x628   :  { %v3609_v15 = vpop.eup %3608 }
 0x629   :  { %v1410_v51 = vmul.f32 %v3609_v15, %v3605_v43  ;;  %v3611_v52 = vpop.eup %3610 }
 0x62a   :  { %v1409_v11 = vmul.f32 %v3611_v52, %v4414_v48 }
 0x62b   :  { %v3613_v59 = vpop.eup %3612 }
 0x62c   :  { %v4456_v61 = vadd.f32 %v1410_v51, %v1409_v11 }
 0x62e   :  { %3614 = vtanh.f32 %v4456_v61 }
 0x638   :  { %v3615_v2 = vpop.eup %3614 }
 0x639   :  { %v1413_v5 = vmul.f32 %v3615_v2, %v3613_v59 }
 0x63b   :  { %1479 = vmatmul.mubr.f32.vlgmr.msra.gmra.mrb[12].mxu0 %v1413_v5  ;;  %1550 = vmatmul.mubr.f32.vlgmr.msra.gmra.mrb[12].mxu1 %v1413_v5 }
 0x63c   :  { %3165 = vmatpush1.bf16.msra.mxu0 %v3857_v35  ;;  %3197 = vmatpush1.bf16.msra.mxu1 %v3866_v38 }
 0x63d   :  { %3167 = vmatprep.subr.bf16.mxu0 %v3878_v42  ;;  %3199 = vmatprep.subr.bf16.mxu1 %v3893_v47 }
 0x63e   :  { %1644 = vmatprep.mubr.f32.mxu0 %v3720_v7  ;;  %1715 = vmatprep.mubr.f32.mxu1 %v3720_v7 }
 0x640   :  { %3169 = vmatpush1.bf16.msra.mxu0 %v3903_v50  ;;  %3201 = vmatpush1.bf16.msra.mxu1 %v3916_v54 }
 0x641   :  { %3171 = vmatprep.subr.bf16.mxu0 %v3926_v57  ;;  %3203 = vmatprep.subr.bf16.mxu1 %v3936_v60 }
 0x644   :  { %3173 = vmatpush1.bf16.msra.mxu0 %v3949_v0  ;;  %3205 = vmatpush1.bf16.msra.mxu1 %v3959_v3 }
 0x645   :  { %3175 = vmatprep.subr.bf16.mxu0 %v3969_v6  ;;  %3207 = vmatprep.subr.bf16.mxu1 %v3979_v10 }
 0x648   :  { %3177 = vmatpush1.bf16.msra.mxu0 %v3992_v14  ;;  %3209 = vmatpush1.bf16.msra.mxu1 %v4002_v17 }
 0x649   :  { %3179 = vmatprep.subr.bf16.mxu0 %v4012_v20  ;;  %3211 = vmatprep.subr.bf16.mxu1 %v4022_v23 }
 0x64c   :  { %3181 = vmatpush1.bf16.msra.mxu0 %v4035_v27  ;;  %3213 = vmatpush1.bf16.msra.mxu1 %v4045_v32 }
 0x64d   :  { %3183 = vmatprep.subr.bf16.mxu0 %v4055_v36  ;;  %3215 = vmatprep.subr.bf16.mxu1 %v4065_v40 }
 0x650   :  { %3185 = vmatpush1.bf16.msra.mxu0 %v4078_v45  ;;  %3217 = vmatpush1.bf16.msra.mxu1 %v4088_v49 }
 0x651   :  { %3187 = vmatprep.subr.bf16.mxu0 %v4098_v53  ;;  %3219 = vmatprep.subr.bf16.mxu1 %v4108_v58 }
 0x654   :  { %3189 = vmatpush1.bf16.msra.mxu0 %v4121_v63  ;;  %3221 = vmatpush1.bf16.msra.mxu1 %v4131_v4 }
 0x655   :  { %3191 = vmatprep.subr.bf16.mxu0 %v4141_v9  ;;  %3223 = vmatprep.subr.bf16.mxu1 %v4151_v13 }
 0x658   :  { %3193 = vmatpush1.bf16.msra.mxu0 %v4158_v16  ;;  %3225 = vmatpush1.bf16.msra.mxu1 %v4162_v18 }
 0x659   :  { %3227 = vmatprep.subr.bf16.mxu0 %v3841_v29  ;;  %3259 = vmatprep.subr.bf16.mxu1 %v3843_v30 }
 0x70e   :  { %v1480_v48 = vpop.f32.mrb[12].mxu0  ;;  %v1551_v8 = vpop.f32.mrb[12].mxu1 }
 0x70f   :  { %v3472_v46 = vadd.f32 %v1480_v48, %v4222_v34  ;;  %v1482_v12 = vpop.f32.mrb[13].mxu0  ;;  %v1553_v56 = vpop.f32.mrb[13].mxu1  ;;  %v3486_v41 = vadd.f32 %v1551_v8, %v4228_v55 }
 0x710   :  { %v3473_v22 = vadd.f32 %v1482_v12, %v4224_v37  ;;  %v3487_v1 = vadd.f32 %v1553_v56, %v4231_v62 }
 0x711   :  { %v2582_v21 = vmul.f32 -1.442695, %v3472_v46  ;;  %v2584_v24 = vmul.f32 -1.442695, %v3486_v41 }
 0x712   :  { %v2583_v39 = vmul.f32 -1.442695, %v3473_v22  ;;  %v4541_v22 = vadd.f32 %v4216_v28, %v4224_v37  ;;  %v4552_v28 = vadd.f32 %v4220_v33, %v4231_v62 }
 0x713   :  { %3616 = vpow2.f32 %v2582_v21 }
 0x714   :  { %3618 = vpow2.f32 %v2583_v39 }
 0x715   :  { %3620 = vtanh.f32 %v3487_v1 }
 0x716   :  { %3622 = vpow2.f32 %v2584_v24 }
 0x71d   :  { %v3617_v43 = vpop.eup %3616 }
 0x71e   :  { %v1565_v44 = vadd.f32 1.0, %v3617_v43  ;;  %v3619_v15 = vpop.eup %3618 }
 0x71f   :  { %v1566_v51 = vadd.f32 1.0, %v3619_v15  ;;  %v3621_v52 = vpop.eup %3620 }
 0x720   :  { %3624 = vrcp.f32 %v1565_v44  ;;  %v3623_v19 = vpop.eup %3622 }
 0x721   :  { %3626 = vrcp.f32 %v1566_v51  ;;  %v1567_v5 = vadd.f32 1.0, %v3623_v19  ;;  %v4547_v51 = vadd.f32 %v4218_v31, %v4228_v55 }
 0x723   :  { %3628 = vrcp.f32 %v1567_v5 }
 0x72a   :  { %v3625_v11 = vpop.eup %3624 }
 0x72b   :  { %v1576_v59 = vmul.f32 %v3625_v11, %v3621_v52  ;;  %v3627_v2 = vpop.eup %3626 }
 0x72c   :  { %v1575_v48 = vmul.f32 %v3627_v2, %v4456_v61  ;;  %v4537_v61 = vadd.f32 %v4214_v25, %v4222_v34 }
 0x72d   :  { %v3629_v46 = vpop.eup %3628 }
 0x72e   :  { %v4498_v8 = vadd.f32 %v1576_v59, %v1575_v48 }
 0x730   :  { %3630 = vtanh.f32 %v4498_v8 }
 0x73a   :  { %v3631_v12 = vpop.eup %3630 }
 0x73b   :  { %v1579_v56 = vmul.f32 %v3631_v12, %v3629_v46 }
 0x73d   :  { %1645 = vmatmul.mubr.f32.vlgmr.msra.gmra.mrb[16].mxu0 %v1579_v56  ;;  %1716 = vmatmul.mubr.f32.vlgmr.msra.gmra.mrb[16].mxu1 %v1579_v56 }
 0x73e   :  { %3229 = vmatpush1.bf16.msra.mxu0 %v3857_v35  ;;  %3261 = vmatpush1.bf16.msra.mxu1 %v3866_v38 }
 0x73f   :  { %3231 = vmatprep.subr.bf16.mxu0 %v3878_v42  ;;  %3263 = vmatprep.subr.bf16.mxu1 %v3893_v47 }
 0x740   :  { %1810 = vmatprep.mubr.f32.mxu0 %v3720_v7  ;;  %1881 = vmatprep.mubr.f32.mxu1 %v3720_v7 }
 0x742   :  { %3233 = vmatpush1.bf16.msra.mxu0 %v3903_v50  ;;  %3265 = vmatpush1.bf16.msra.mxu1 %v3916_v54 }
 0x743   :  { %3235 = vmatprep.subr.bf16.mxu0 %v3926_v57  ;;  %3267 = vmatprep.subr.bf16.mxu1 %v3936_v60 }
 0x746   :  { %3237 = vmatpush1.bf16.msra.mxu0 %v3949_v0  ;;  %3269 = vmatpush1.bf16.msra.mxu1 %v3959_v3 }
 0x747   :  { %3239 = vmatprep.subr.bf16.mxu0 %v3969_v6  ;;  %3271 = vmatprep.subr.bf16.mxu1 %v3979_v10 }
 0x74a   :  { %3241 = vmatpush1.bf16.msra.mxu0 %v3992_v14  ;;  %3273 = vmatpush1.bf16.msra.mxu1 %v4002_v17 }
 0x74b   :  { %3243 = vmatprep.subr.bf16.mxu0 %v4012_v20  ;;  %3275 = vmatprep.subr.bf16.mxu1 %v4022_v23 }
 0x74e   :  { %3245 = vmatpush1.bf16.msra.mxu0 %v4035_v27  ;;  %3277 = vmatpush1.bf16.msra.mxu1 %v4045_v32 }
 0x74f   :  { %3247 = vmatprep.subr.bf16.mxu0 %v4055_v36  ;;  %3279 = vmatprep.subr.bf16.mxu1 %v4065_v40 }
 0x752   :  { %3249 = vmatpush1.bf16.msra.mxu0 %v4078_v45  ;;  %3281 = vmatpush1.bf16.msra.mxu1 %v4088_v49 }
 0x753   :  { %3251 = vmatprep.subr.bf16.mxu0 %v4098_v53  ;;  %3283 = vmatprep.subr.bf16.mxu1 %v4108_v58 }
 0x756   :  { %3253 = vmatpush1.bf16.msra.mxu0 %v4121_v63  ;;  %3285 = vmatpush1.bf16.msra.mxu1 %v4131_v4 }
 0x757   :  { %3255 = vmatprep.subr.bf16.mxu0 %v4141_v9  ;;  %3287 = vmatprep.subr.bf16.mxu1 %v4151_v13 }
 0x75a   :  { %3257 = vmatpush1.bf16.msra.mxu0 %v4158_v16  ;;  %3289 = vmatpush1.bf16.msra.mxu1 %v4162_v18 }
 0x75b   :  { %3291 = vmatprep.subr.bf16.mxu0 %v3841_v29  ;;  %3323 = vmatprep.subr.bf16.mxu1 %v3843_v30 }
 0x810   :  { %v1646_v21 = vpop.f32.mrb[16].mxu0  ;;  %v1717_v39 = vpop.f32.mrb[16].mxu1 }
 0x811   :  { %v1647_v41 = vadd.f32 %v1646_v21, %v4537_v61  ;;  %v1648_v1 = vpop.f32.mrb[17].mxu0  ;;  %v1719_v24 = vpop.f32.mrb[17].mxu1  ;;  %v1718_v25 = vadd.f32 %v1717_v39, %v4547_v51 }
 0x812   :  { %v1649_v43 = vadd.f32 %v1648_v1, %v4541_v22  ;;  %v1720_v34 = vadd.f32 %v1719_v24, %v4552_v28 }
 0x813   :  { %v2585_v44 = vmul.f32 -1.442695, %v1647_v41  ;;  %v2587_v37 = vmul.f32 -1.442695, %v1718_v25 }
 0x814   :  { %v2586_v15 = vmul.f32 -1.442695, %v1649_v43 }
 0x815   :  { %3632 = vpow2.f32 %v2585_v44 }
 0x816   :  { %3634 = vpow2.f32 %v2586_v15 }
 0x817   :  { %3636 = vtanh.f32 %v1720_v34 }
 0x818   :  { %3638 = vpow2.f32 %v2587_v37 }
 0x81f   :  { %v3633_v52 = vpop.eup %3632 }
 0x820   :  { %v1731_v19 = vadd.f32 1.0, %v3633_v52  ;;  %v3635_v11 = vpop.eup %3634 }
 0x821   :  { %v1732_v59 = vadd.f32 1.0, %v3635_v11  ;;  %v3637_v31 = vpop.eup %3636 }
 0x822   :  { %3640 = vrcp.f32 %v1731_v19  ;;  %v3639_v55 = vpop.eup %3638 }
 0x823   :  { %3642 = vrcp.f32 %v1732_v59  ;;  %v1733_v46 = vadd.f32 1.0, %v3639_v55 }
 0x825   :  { %3644 = vrcp.f32 %v1733_v46 }
 0x82c   :  { %v3641_v2 = vpop.eup %3640 }
 0x82d   :  { %v1742_v5 = vmul.f32 %v3641_v2, %v3637_v31  ;;  %v3643_v48 = vpop.eup %3642 }
 0x82e   :  { %v1741_v33 = vmul.f32 %v3643_v48, %v4498_v8 }
 0x82f   :  { %v3645_v12 = vpop.eup %3644 }
 0x830   :  { %v4556_v62 = vadd.f32 %v1742_v5, %v1741_v33 }
 0x832   :  { %3646 = vtanh.f32 %v4556_v62 }
 0x83c   :  { %v3647_v56 = vpop.eup %3646 }
 0x83d   :  { %v4559_v21 = vmul.f32 %v3647_v56, %v3645_v12 }
 0x83f   :  { %1811 = vmatmul.mubr.f32.vlgmr.msra.gmra.mrb[18].mxu0 %v4559_v21  ;;  %1882 = vmatmul.mubr.f32.vlgmr.msra.gmra.mrb[18].mxu1 %v4559_v21 }
 0x840   :  { %3293 = vmatpush1.bf16.msra.mxu0 %v3857_v35  ;;  %3325 = vmatpush1.bf16.msra.mxu1 %v3866_v38 }
 0x841   :  { %3295 = vmatprep.subr.bf16.mxu0 %v3878_v42  ;;  %3327 = vmatprep.subr.bf16.mxu1 %v3893_v47 }
 0x842   :  { %1983 = vmatprep.mubr.f32.mxu0 %v3720_v7  ;;  %2054 = vmatprep.mubr.f32.mxu1 %v3720_v7 }
 0x844   :  { %3297 = vmatpush1.bf16.msra.mxu0 %v3903_v50  ;;  %3329 = vmatpush1.bf16.msra.mxu1 %v3916_v54 }
 0x845   :  { %3299 = vmatprep.subr.bf16.mxu0 %v3926_v57  ;;  %3331 = vmatprep.subr.bf16.mxu1 %v3936_v60 }
 0x848   :  { %3301 = vmatpush1.bf16.msra.mxu0 %v3949_v0  ;;  %3333 = vmatpush1.bf16.msra.mxu1 %v3959_v3 }
 0x849   :  { %3303 = vmatprep.subr.bf16.mxu0 %v3969_v6  ;;  %3335 = vmatprep.subr.bf16.mxu1 %v3979_v10 }
 0x84c   :  { %3305 = vmatpush1.bf16.msra.mxu0 %v3992_v14  ;;  %3337 = vmatpush1.bf16.msra.mxu1 %v4002_v17 }
 0x84d   :  { %3307 = vmatprep.subr.bf16.mxu0 %v4012_v20  ;;  %3339 = vmatprep.subr.bf16.mxu1 %v4022_v23 }
 0x850   :  { %3309 = vmatpush1.bf16.msra.mxu0 %v4035_v27  ;;  %3341 = vmatpush1.bf16.msra.mxu1 %v4045_v32 }
 0x851   :  { %3311 = vmatprep.subr.bf16.mxu0 %v4055_v36  ;;  %3343 = vmatprep.subr.bf16.mxu1 %v4065_v40 }
 0x854   :  { %3313 = vmatpush1.bf16.msra.mxu0 %v4078_v45  ;;  %3345 = vmatpush1.bf16.msra.mxu1 %v4088_v49 }
 0x855   :  { %3315 = vmatprep.subr.bf16.mxu0 %v4098_v53  ;;  %3347 = vmatprep.subr.bf16.mxu1 %v4108_v58 }
 0x858   :  { %3317 = vmatpush1.bf16.msra.mxu0 %v4121_v63  ;;  %3349 = vmatpush1.bf16.msra.mxu1 %v4131_v4 }
 0x859   :  { %3319 = vmatprep.subr.bf16.mxu0 %v4141_v9  ;;  %3351 = vmatprep.subr.bf16.mxu1 %v4151_v13 }
 0x85c   :  { %3321 = vmatpush1.bf16.msra.mxu0 %v4158_v16  ;;  %3353 = vmatpush1.bf16.msra.mxu1 %v4162_v18 }
 0x85d   :  { %3355 = vmatprep.subr.bf16.mxu0 %v3841_v29  ;;  %3387 = vmatprep.subr.bf16.mxu1 %v3843_v30 }
 0x912   :  { %v1812_v8 = vpop.f32.mrb[18].mxu0  ;;  %v1883_v39 = vpop.f32.mrb[18].mxu1 }
 0x913   :  { %v1813_v41 = vadd.f32 %v1812_v8, %v4537_v61  ;;  %v1814_v1 = vpop.f32.mrb[19].mxu0  ;;  %v1885_v24 = vpop.f32.mrb[19].mxu1  ;;  %v1884_v25 = vadd.f32 %v1883_v39, %v4547_v51 }
 0x914   :  { %v1815_v43 = vadd.f32 %v1814_v1, %v4541_v22  ;;  %v1886_v34 = vadd.f32 %v1885_v24, %v4552_v28  ;;  %v2265_v1 = vld [vmem:[%s4794_s4 + $0x18] sm:$0xff] }
 0x915   :  { %v2588_v44 = vmul.f32 -1.442695, %v1813_v41  ;;  %v2590_v37 = vmul.f32 -1.442695, %v1884_v25  ;;  %v2264_v41 = vld [vmem:[%s4794_s4 + $0x10] sm:$0xff] }
 0x916   :  { %v2589_v15 = vmul.f32 -1.442695, %v1815_v43  ;;  %v3422_v24 = vpack.c.bf16 %v2265_v1, %v2264_v41  ;;  %v2266_v43 = vld [vmem:[%s4794_s4 + $0x20] sm:$0xff]  ;;  %v2268_v25 = vld [vmem:[%s4794_s4 + $0x30] sm:$0xff]  ;;  %v2447_v41 = vld [vmem:[%s4798_s8 + $0x8] sm:$0xff] }
 0x917   :  { %3648 = vpow2.f32 %v2588_v44  ;;  %v2267_v44 = vld [vmem:[%s4794_s4 + $0x28] sm:$0xff] }
 0x918   :  { %3650 = vpow2.f32 %v2589_v15  ;;  %v3425_v15 = vpack.c.bf16 %v2267_v44, %v2266_v43 }
 0x919   :  { %3652 = vtanh.f32 %v1886_v34  ;;  %v2269_v34 = vld [vmem:[%s4794_s4 + $0x38] sm:$0xff] }
 0x91a   :  { %3654 = vpow2.f32 %v2590_v37  ;;  %v3428_v37 = vpack.c.bf16 %v2269_v34, %v2268_v25  ;;  %v2448_v25 = vld [vmem:[%s4798_s8 + $0x10] sm:$0xff]  ;;  %v2449_v34 = vld [vmem:[%s4798_s8 + $0x18] sm:$0xff] }
 0x921   :  { %v3649_v29 = vpop.eup %3648 }
 0x922   :  { %v1897_v52 = vadd.f32 1.0, %v3649_v29  ;;  %v3651_v30 = vpop.eup %3650  ;;  %v2270_v29 = vld [vmem:[%s4794_s4 + $0x40] sm:$0xff] }
 0x923   :  { %v1898_v19 = vadd.f32 1.0, %v3651_v30  ;;  %v3653_v11 = vpop.eup %3652 }
 0x924   :  { %3656 = vrcp.f32 %v1897_v52  ;;  %v3655_v59 = vpop.eup %3654  ;;  %v2271_v52 = vld [vmem:[%s4794_s4 + $0x48] sm:$0xff] }
 0x925   :  { %3658 = vrcp.f32 %v1898_v19  ;;  %v1899_v5 = vadd.f32 1.0, %v3655_v59  ;;  %v3431_v30 = vpack.c.bf16 %v2271_v52, %v2270_v29  ;;  %v2272_v19 = vld [vmem:[%s4794_s4 + $0x50] sm:$0xff]  ;;  %v2274_v59 = vld [vmem:[%s4794_s4 + $0x60] sm:$0xff] }
 0x926   :  { %v2598_v29 = vld [vmem:[%s4797_s7] ss:$0 sm:$0xff] }
 0x927   :  { %3660 = vrcp.f32 %v1899_v5  ;;  %v2276_v5 = vld [vmem:[%s4794_s4 + $0x70] sm:$0xff] }
 0x92e   :  { %v3657_v31 = vpop.eup %3656 }
 0x92f   :  { %v1908_v55 = vmul.f32 %v3657_v31, %v3653_v11  ;;  %v3659_v2 = vpop.eup %3658  ;;  %v2273_v11 = vld [vmem:[%s4794_s4 + $0x58] sm:$0xff] }
 0x930   :  { %v1907_v48 = vmul.f32 %v3659_v2, %v4556_v62  ;;  %v3434_v31 = vpack.c.bf16 %v2273_v11, %v2272_v19 }
 0x931   :  { %v3661_v12 = vpop.eup %3660 }
 0x932   :  { %v1909_v46 = vadd.f32 %v1908_v55, %v1907_v48  ;;  %v2275_v55 = vld [vmem:[%s4794_s4 + $0x68] sm:$0xff]  ;;  %v2277_v48 = vld [vmem:[%s4794_s4 + $0x78] sm:$0xff] }
 0x933   :  { %v3437_v2 = vpack.c.bf16 %v2275_v55, %v2274_v59 }
 0x934   :  { %3662 = vtanh.f32 %v1909_v46  ;;  %v4604_v33 = vsel %vm1912_vm4, %v1909_v46, %v4556_v62  ;;  %v3440_v46 = vpack.c.bf16 %v2277_v48, %v2276_v5 }
 0x93e   :  { %v3663_v56 = vpop.eup %3662 }
 0x93f   :  { %v1911_v8 = vmul.f32 %v3663_v56, %v3661_v12  ;;  %v2357_v12 = vld [vmem:[%s4796_s6 + $0x8] sm:$0xff]  ;;  %v2358_v56 = vld [vmem:[%s4796_s6 + $0x10] sm:$0xff] }
 0x941   :  { %v4607_v39 = vsel %vm1912_vm4, %v1911_v8, %v4559_v21  ;;  %v3721_v21 = vmov 0.0|0.0  }
 0x942   :  { %1984 = vmatmul.mubr.f32.vlgmr.msra.gmra.mrb[20].mxu0 %v4607_v39  ;;  %2055 = vmatmul.mubr.f32.vlgmr.msra.gmra.mrb[20].mxu1 %v4607_v39 }
 0x943   :  { %3357 = vmatpush1.bf16.msra.mxu0 %v3857_v35  ;;  %3389 = vmatpush1.bf16.msra.mxu1 %v3866_v38 }
 0x944   :  { %3359 = vmatprep.subr.bf16.mxu0 %v3878_v42  ;;  %3391 = vmatprep.subr.bf16.mxu1 %v3893_v47 }
 0x945   :  { %2155 = vmatprep.mubr.f32.mxu0 %v3720_v7  ;;  %2226 = vmatprep.mubr.f32.mxu1 %v3720_v7 }
 0x947   :  { %3361 = vmatpush1.bf16.msra.mxu0 %v3903_v50  ;;  %3393 = vmatpush1.bf16.msra.mxu1 %v3916_v54 }
 0x948   :  { %3363 = vmatprep.subr.bf16.mxu0 %v3926_v57  ;;  %3395 = vmatprep.subr.bf16.mxu1 %v3936_v60 }
 0x94b   :  { %3365 = vmatpush1.bf16.msra.mxu0 %v3949_v0  ;;  %3397 = vmatpush1.bf16.msra.mxu1 %v3959_v3 }
 0x94c   :  { %3367 = vmatprep.subr.bf16.mxu0 %v3969_v6  ;;  %3399 = vmatprep.subr.bf16.mxu1 %v3979_v10 }
 0x94f   :  { %3369 = vmatpush1.bf16.msra.mxu0 %v3992_v14  ;;  %3401 = vmatpush1.bf16.msra.mxu1 %v4002_v17 }
 0x950   :  { %3371 = vmatprep.subr.bf16.mxu0 %v4012_v20  ;;  %3403 = vmatprep.subr.bf16.mxu1 %v4022_v23 }
 0x953   :  { %3373 = vmatpush1.bf16.msra.mxu0 %v4035_v27  ;;  %3405 = vmatpush1.bf16.msra.mxu1 %v4045_v32 }
 0x954   :  { %3375 = vmatprep.subr.bf16.mxu0 %v4055_v36  ;;  %3407 = vmatprep.subr.bf16.mxu1 %v4065_v40 }
 0x957   :  { %3377 = vmatpush1.bf16.msra.mxu0 %v4078_v45  ;;  %3409 = vmatpush1.bf16.msra.mxu1 %v4088_v49 }
 0x958   :  { %3379 = vmatprep.subr.bf16.mxu0 %v4098_v53  ;;  %3411 = vmatprep.subr.bf16.mxu1 %v4108_v58 }
 0x95b   :  { %3381 = vmatpush1.bf16.msra.mxu0 %v4121_v63  ;;  %3413 = vmatpush1.bf16.msra.mxu1 %v4131_v4 }
 0x95c   :  { %3383 = vmatprep.subr.bf16.mxu0 %v4141_v9  ;;  %3415 = vmatprep.subr.bf16.mxu1 %v4151_v13 }
 0x95f   :  { %3385 = vmatpush1.bf16.msra.mxu0 %v4158_v16  ;;  %3417 = vmatpush1.bf16.msra.mxu1 %v4162_v18  ;;  %v2262_v16 = vld [vmem:[%s4794_s4] sm:$0xff]  ;;  %v2263_v18 = vld [vmem:[%s4794_s4 + $0x8] sm:$0xff] }
 0x960   :  { %v3419_v62 = vpack.c.bf16 %v2263_v18, %v2262_v16  ;;  %3418 = vmatprep.subr.bf16.mxu0 %v3721_v21  ;;  %3442 = vmatprep.subr.bf16.mxu1 %v3721_v21  ;;  %v2362_v18 = vld [vmem:[%s4796_s6 + $0x30] sm:$0xff] }
 0xa15   :  { %v1985_v35 = vpop.f32.mrb[20].mxu0  ;;  %v2056_v38 = vpop.f32.mrb[20].mxu1 }
 0xa16   :  { %v1986_v42 = vadd.f32 %v1985_v35, %v4537_v61  ;;  %v1987_v47 = vpop.f32.mrb[21].mxu0  ;;  %v2058_v50 = vpop.f32.mrb[21].mxu1  ;;  %v2057_v0 = vadd.f32 %v2056_v38, %v4547_v51  ;;  %v2360_v38 = vld [vmem:[%s4796_s6 + $0x20] sm:$0xff] }
 0xa17   :  { %v1988_v54 = vadd.f32 %v1987_v47, %v4541_v22  ;;  %v2059_v3 = vadd.f32 %v2058_v50, %v4552_v28 }
 0xa18   :  { %v2591_v57 = vmul.f32 -1.442695, %v1986_v42  ;;  %v2593_v6 = vmul.f32 -1.442695, %v2057_v0  ;;  %v2361_v42 = vld [vmem:[%s4796_s6 + $0x28] sm:$0xff] }
 0xa19   :  { %v2592_v60 = vmul.f32 -1.442695, %v1988_v54  ;;  %v3449_v47 = vpack.c.bf16 %v2361_v42, %v2360_v38 }
 0xa1a   :  { %3664 = vpow2.f32 %v2591_v57 }
 0xa1b   :  { %3666 = vpow2.f32 %v2592_v60 }
 0xa1c   :  { %3668 = vtanh.f32 %v2059_v3 }
 0xa1d   :  { %3670 = vpow2.f32 %v2593_v6 }
 0xa24   :  { %v3665_v10 = vpop.eup %3664 }
 0xa25   :  { %v2070_v14 = vadd.f32 1.0, %v3665_v10  ;;  %v3667_v17 = vpop.eup %3666 }
 0xa26   :  { %v2071_v20 = vadd.f32 1.0, %v3667_v17  ;;  %v3669_v23 = vpop.eup %3668 }
 0xa27   :  { %3672 = vrcp.f32 %v2070_v14  ;;  %v3671_v27 = vpop.eup %3670 }
 0xa28   :  { %3674 = vrcp.f32 %v2071_v20  ;;  %v2072_v45 = vadd.f32 1.0, %v3671_v27 }
 0xa2a   :  { %3676 = vrcp.f32 %v2072_v45 }
 0xa31   :  { %v3673_v32 = vpop.eup %3672 }
 0xa32   :  { %v2081_v36 = vmul.f32 %v3673_v32, %v3669_v23  ;;  %v3675_v40 = vpop.eup %3674 }
 0xa33   :  { %v2080_v49 = vmul.f32 %v3675_v40, %v4604_v33 }
 0xa34   :  { %v3677_v63 = vpop.eup %3676 }
 0xa35   :  { %v2082_v53 = vadd.f32 %v2081_v36, %v2080_v49 }
 0xa37   :  { %3678 = vtanh.f32 %v2082_v53  ;;  %v4650_v58 = vsel %vm2085_vm5, %v2082_v53, %v4604_v33  ;;  %v2356_v33 = vld [vmem:[%s4796_s6] sm:$0xff] }
 0xa38   :  { %v3443_v8 = vpack.c.bf16 %v2357_v12, %v2356_v33 }
 0xa41   :  { %v3679_v4 = vpop.eup %3678 }
 0xa42   :  { %v2084_v9 = vmul.f32 %v3679_v4, %v3677_v63 }
 0xa44   :  { %v4653_v13 = vsel %vm2085_vm5, %v2084_v9, %v4607_v39  ;;  %v2359_v39 = vld [vmem:[%s4796_s6 + $0x18] sm:$0xff] }
 0xa45   :  { %2156 = vmatmul.mubr.f32.vlgmr.msra.gmra.mrb[22].mxu0 %v4653_v13  ;;  %2227 = vmatmul.mubr.f32.vlgmr.msra.gmra.mrb[22].mxu1 %v4653_v13  ;;  %v3446_v35 = vpack.c.bf16 %v2359_v39, %v2358_v56 }
 0xa46   :  { %3420 = vmatpush3.bf16.msra.mxu0 %v3419_v62  ;;  %2665 = vmatprep.mubr.msk.f32.mxu0 %vm3722_vm6, %v3720_v7  ;;  %v2363_v62 = vld [vmem:[%s4796_s6 + $0x38] sm:$0xff] }
 0xa47   :  { %3421 = vmatprep.subr.bf16.mxu0 %v3721_v21  ;;  %2684 = vmatprep.mubr.msk.f32.mxu1 %vm3722_vm6, %v3720_v7 }
 0xa48   :  { %3444 = vmatpush3.bf16.msra.mxu1 %v3443_v8 }
 0xa49   :  { %3445 = vmatprep.subr.bf16.mxu1 %v3721_v21 }
 0xa4a   :  { %3423 = vmatpush3.bf16.msra.mxu0 %v3422_v24 }
 0xa4b   :  { %3424 = vmatprep.subr.bf16.mxu0 %v3721_v21 }
 0xa4c   :  { %3447 = vmatpush3.bf16.msra.mxu1 %v3446_v35 }
 0xa4d   :  { %3448 = vmatprep.subr.bf16.mxu1 %v3721_v21 }
 0xa4e   :  { %3426 = vmatpush3.bf16.msra.mxu0 %v3425_v15 }
 0xa4f   :  { %3427 = vmatprep.subr.bf16.mxu0 %v3721_v21 }
 0xa50   :  { %3450 = vmatpush3.bf16.msra.mxu1 %v3449_v47 }
 0xa51   :  { %3451 = vmatprep.subr.bf16.mxu1 %v3721_v21 }
 0xa52   :  { %3429 = vmatpush3.bf16.msra.mxu0 %v3428_v37  ;;  %v3458_v37 = vpack.c.bf16 %v2449_v34, %v2448_v25 }
 0xa53   :  { %3430 = vmatprep.subr.bf16.mxu0 %v3721_v21 }
 0xa56   :  { %3432 = vmatpush3.bf16.msra.mxu0 %v3431_v30 }
 0xa57   :  { %3433 = vmatprep.subr.bf16.mxu0 %v3721_v21 }
 0xa5a   :  { %3435 = vmatpush3.bf16.msra.mxu0 %v3434_v31 }
 0xa5b   :  { %3436 = vmatprep.subr.bf16.mxu0 %v3721_v21 }
 0xa5e   :  { %3438 = vmatpush3.bf16.msra.mxu0 %v3437_v2 }
 0xa5f   :  { %3439 = vmatprep.subr.bf16.mxu0 %v3721_v21 }
 0xa62   :  { %3441 = vmatpush3.bf16.msra.mxu0 %v3440_v46 }
 0xb18   :  { %v2157_v50 = vpop.f32.mrb[22].mxu0  ;;  %v2228_v54 = vpop.f32.mrb[22].mxu1 }
 0xb19   :  { %v2158_v57 = vadd.f32 %v2157_v50, %v4537_v61  ;;  %v2159_v60 = vpop.f32.mrb[23].mxu0  ;;  %v2230_v0 = vpop.f32.mrb[23].mxu1  ;;  %v2229_v14 = vadd.f32 %v2228_v54, %v4547_v51 }
 0xb1a   :  { %v2160_v3 = vadd.f32 %v2159_v60, %v4541_v22  ;;  %v2231_v17 = vadd.f32 %v2230_v0, %v4552_v28 }
 0xb1b   :  { %v2594_v6 = vmul.f32 -1.442695, %v2158_v57  ;;  %v2596_v20 = vmul.f32 -1.442695, %v2229_v14 }
 0xb1c   :  { %v2595_v10 = vmul.f32 -1.442695, %v2160_v3 }
 0xb1d   :  { %3680 = vpow2.f32 %v2594_v6 }
 0xb1e   :  { %3682 = vpow2.f32 %v2595_v10 }
 0xb1f   :  { %3684 = vtanh.f32 %v2231_v17 }
 0xb20   :  { %3686 = vpow2.f32 %v2596_v20 }
 0xb27   :  { %v3681_v23 = vpop.eup %3680 }
 0xb28   :  { %v2242_v27 = vadd.f32 1.0, %v3681_v23  ;;  %v3683_v32 = vpop.eup %3682 }
 0xb29   :  { %v2243_v61 = vadd.f32 1.0, %v3683_v32  ;;  %v3685_v36 = vpop.eup %3684 }
 0xb2a   :  { %3688 = vrcp.f32 %v2242_v27  ;;  %v3687_v40 = vpop.eup %3686 }
 0xb2b   :  { %3690 = vrcp.f32 %v2243_v61  ;;  %v2244_v53 = vadd.f32 1.0, %v3687_v40 }
 0xb2d   :  { %3692 = vrcp.f32 %v2244_v53 }
 0xb34   :  { %v3689_v22 = vpop.eup %3688 }
 0xb35   :  { %v2253_v45 = vmul.f32 %v3689_v22, %v3685_v36  ;;  %v3691_v49 = vpop.eup %3690 }
 0xb36   :  { %v2252_v63 = vmul.f32 %v3691_v49, %v4650_v58  ;;  %v3452_v58 = vpack.c.bf16 %v2363_v62, %v2362_v18 }
 0xb37   :  { %v3693_v28 = vpop.eup %3692 }
 0xb38   :  { %v2254_v51 = vadd.f32 %v2253_v45, %v2252_v63  ;;  %3453 = vmatpush3.bf16.msra.mxu1 %v3452_v58 }
 0xb39   :  { %3454 = vmatprep.subr.bf16.mxu1 %v3721_v21 }
 0xb3a   :  { %3694 = vtanh.f32 %v2254_v51 }
 0xb44   :  { %v3695_v4 = vpop.eup %3694 }
 0xb45   :  { %v2256_v9 = vmul.f32 %v3695_v4, %v3693_v28 }
 0xb47   :  { %v2261_v16 = vsel %vm2257_vm7, %v2256_v9, %v4653_v13  ;;  %v2446_v13 = vld [vmem:[%s4798_s8] sm:$0xff]  ;;  %s3696_s8 = scalar_lea.vmem %s2539_s1, 128 }
 0xb48   :  { %2666 = vmatmul.mubr.f32.vlgmr.msra.gmra.mrb[24].mxu0 %v2261_v16  ;;  %v3455_v44 = vpack.c.bf16 %v2447_v41, %v2446_v13  ;;  %p3697_p0 = scmp.ne.s32.totalorder %s2539_s1, %s3696_s8  ;;  %p3702_p2 = scmp.lt.s32.totalorder %s3696_s8, %s3696_s8 }
 0xb4a   :  { %p3703_p3 = por %p3702_p2, %p3701_p1 }
 0xb4c   :  { %p3704_p4 = pnand %p3703_p3, %p3697_p0 }
 0xc1b   :  { %v2351_v1 = vpop.f32.mrb[24].mxu0 }
 0xc1c   :  { %v2352_v24 = vadd.f32 %v2597_v26, %v2351_v1  ;;  %v2667_v43 = vpop.f32.mrb[25].mxu0 }
 0xc1e   :  { %v2355_v15 = vmax.f32 %v2352_v24, 0.0 }
 0xc20   :  { %2685 = vmatmul.mubr.msk.f32.vlgmr.msra.gmra.mrb[24].mxu1 %vm2371_vm8, %v2355_v15 }
 0xc21   :  { %3456 = vmatpush3.bf16.msra.mxu1 %v3455_v44  ;;  %2695 = vmatprep.mubr.msk.f32.mxu1 %vm3722_vm6, %v3720_v7 }
 0xc22   :  { %3457 = vmatprep.subr.bf16.mxu1 %v3721_v21  ;;  %v2600_v21 = vld [vmem:[%s4799_s9] ss:$0 sm:$0xff] }
 0xc25   :  { %3459 = vmatpush3.bf16.msra.mxu1 %v3458_v37 }
 0xcf3   :  { %v2441_v52 = vpop.f32.mrb[24].mxu1 }
 0xcf4   :  { %v2442_v30 = vadd.f32 %v2598_v29, %v2441_v52  ;;  %v2686_v19 = vpop.f32.mrb[25].mxu1 }
 0xcf6   :  { %v2445_v7 = vmax.f32 %v2442_v30, 0.0 }
 0xcf8   :  { %2696 = vmatmul.mubr.msk.f32.vlgmr.msra.gmra.mrb[26].mxu1 %vm82_vm0, %v2445_v7 }
 0xdcb   :  { %v2526_v11 = vpop.f32.mrb[26].mxu1 }
 0xdcc   :  { %v2527_v59 = vadd.f32 %v2600_v21, %v2526_v11  ;;  %v2697_v31 = vpop.f32.mrb[27].mxu1 }
 0xdce   :  { %2531 = vst.msk [vmem:[#allocation2] sm:$0xff] %vm2530_vm9, %v2527_v59 }
 0xdcf   :  { %3707 = shalt.err (!%p3704_p4)
}
 0xdd0   :  { %s3708_s14 = scalar_lea.hbm %s4800_s10, 128 }
 0xdd1   :  { %p3709_p5 = scmp.ne.s32.totalorder %s4800_s10, %s3708_s14  ;;  %p3712_p6 = scmp.lt.u32.totalorder %s3708_s14, %s4800_s10 }
 0xdd3   :  { %p3714_p7 = pnand %p3712_p6, %p3709_p5 }
 0xdd5   :  { %3717 = shalt.err (!%p3714_p7)
}
 0xdd6   :  { %2541 = dma.vmem_to_hbm [thread:$0]  %s2539_s1, 128, %s4800_s10, [#allocation3]  }
 0xdd7   :  { %3718 = dma.done.wait [#allocation3], 128  }
 0xdd8   :  { %3719 = vsyncadd [#allocation3], 4294967168 }
 0xdd9   :  { %2545 = vsyncpa [#allocation3], 1 }

</bundles_post_ra>
